<compile_context>
chip_gen: v7x
topology: tpu7x:2x2x1
jax: 0.10.0
libtpu: 0.0.40
codegen_flags: <defaults>
</compile_context>

<pallas_src>
import jax
import jax.numpy as jnp
from jax.experimental import pallas as pl
from jax.experimental.pallas import tpu as pltpu


def _relu(x):
    return jnp.maximum(x, 0.0)


def _round_up(x, m):
    return ((x + m - 1) // m) * m


def fc_tree_net_kernel(
    nodes_ref,      # (6, b_tile, in_dim)    node labels, role-major, f32
    img_ref,        # (b_tile * P, img_dim)  image features, f32
    ind_ref,        # (b_tile, 1)            branch indicator, f32
    wfc_ref, bfc_ref,                 # (in_dim, in_dim) cdt, (1, in_dim) f32
    wnode_ref,                        # (in_dim, 4*img_dim) cdt  [leaf|mid|merge|root node halves]
    wl_f_ref, bl_ref,                 # (img_dim, img_dim) cdt, (1, img_dim) f32
    wm_f_ref, bm_ref,
    wg_f_ref, bg_ref,
    wr_f_ref, br_ref,
    out_ref,        # (b_tile * P, img_dim) f32
):
    _, bt, in_dim = nodes_ref.shape
    M, img_dim = img_ref.shape
    P = M // bt
    cdt = wfc_ref.dtype                      # matmul operand (compute) dtype

    # ---------------- per-batch node path (no P-fold redundancy) -------------
    wfc = wfc_ref[...]
    bfc = bfc_ref[...]
    wnode = wnode_ref[...]                   # (in_dim, 4*img_dim)

    if bt % 8 == 0:
        # Fused: one (6*bt, in_dim) fc dot, then ONE wide (6*bt, 4*img_dim) dot
        # that produces the node-half contribution of every (role, layer) pair.
        nl = nodes_ref[...].reshape(6 * bt, in_dim).astype(cdt)
        nfc = (jnp.dot(nl, wfc, preferred_element_type=jnp.float32)
               + bfc).astype(cdt)
        c_all = jnp.dot(nfc, wnode, preferred_element_type=jnp.float32)

        def role_layer(role, layer):         # (bt, img_dim) f32
            return c_all[role * bt:(role + 1) * bt,
                         layer * img_dim:(layer + 1) * img_dim]
    else:
        # Tiny-batch fallback (bt not sublane-aligned): per-role dots, still
        # against the fused wide node-weight (6 dots instead of 24).
        nfc = [(jnp.dot(nodes_ref[j].astype(cdt), wfc,
                        preferred_element_type=jnp.float32) + bfc).astype(cdt)
               for j in range(6)]
        c_roles = [jnp.dot(r, wnode, preferred_element_type=jnp.float32)
                   for r in nfc]

        def role_layer(role, layer):
            return c_roles[role][:, layer * img_dim:(layer + 1) * img_dim]

    bl = bl_ref[...]
    bm = bm_ref[...]
    bg = bg_ref[...]
    br = br_ref[...]

    # Role indices match the reference: root=0, merge=1, inter_l=2, leaf_l=3,
    # inter_r=4, leaf_r=5.  Layer order in wnode: leaf=0, middle=1, merge=2, root=3.
    c_ll = role_layer(3, 0) + bl
    c_lr = role_layer(5, 0) + bl
    c_il = role_layer(2, 1) + bm
    c_ir = role_layer(4, 1) + bm
    c_mg = role_layer(1, 2) + bg
    c_rt = role_layer(0, 3) + br

    # ---------------- per-(batch, panel) image hot path ----------------------
    img = img_ref[...].astype(cdt)                                  # (M, img)
    wl_f = wl_f_ref[...]
    wm_f = wm_f_ref[...]
    wg_f = wg_f_ref[...]
    wr_f = wr_f_ref[...]
    ind = ind_ref[...]                                              # (bt, 1)

    aligned = (P % 8 == 0)                   # (bt, P, img) view is a clean retile

    def per_batch_relu(x, c, scale=None):
        """x: (M, img) f32 per-row pre-activation; c: (bt, img) f32 per-batch term.
        Adds c broadcast over the P panel pairs of each batch, applies ReLU and
        (optionally) the per-batch indicator scale, without materializing any
        (M, img) broadcast buffer when P is sublane-aligned."""
        if aligned:
            y = _relu(x.reshape(bt, P, img_dim) + c[:, None, :])
            if scale is not None:
                y = y * scale[:, None, :]
            return y.reshape(M, img_dim)
        # Fallback for unaligned P: materialize the broadcast (still exact).
        cb = jnp.broadcast_to(c[:, None, :], (bt, P, img_dim)).reshape(M, img_dim)
        y = _relu(x + cb)
        if scale is not None:
            sb = jnp.broadcast_to(scale[:, None, :], (bt, P, 1)).reshape(M, 1)
            y = y * sb
        return y

    # Leaf layer: feature half is identical for left/right -> computed once.
    img_leaf = jnp.dot(img, wl_f, preferred_element_type=jnp.float32)
    out_leaf_l = per_batch_relu(img_leaf, c_ll).astype(cdt)
    out_leaf_r = per_batch_relu(img_leaf, c_lr).astype(cdt)

    # Middle layer: two separate dots when M already saturates the MXU; the
    # (2M, img) concat copy is only worth it for tiny tiles.
    if M >= 256:
        mid_l = jnp.dot(out_leaf_l, wm_f, preferred_element_type=jnp.float32)
        mid_r = jnp.dot(out_leaf_r, wm_f, preferred_element_type=jnp.float32)
    else:
        mid = jnp.dot(jnp.concatenate([out_leaf_l, out_leaf_r], axis=0), wm_f,
                      preferred_element_type=jnp.float32)
        mid_l, mid_r = mid[:M], mid[M:]
    out_left = per_batch_relu(mid_l, c_il)                          # f32
    out_right = per_batch_relu(mid_r, c_ir, scale=ind)              # f32

    # Merge layer.
    mg = jnp.dot((out_left + out_right).astype(cdt), wg_f,
                 preferred_element_type=jnp.float32)
    out_merge = per_batch_relu(mg, c_mg).astype(cdt)

    # Root layer.
    rt = jnp.dot(out_merge, wr_f, preferred_element_type=jnp.float32)
    out_root = per_batch_relu(rt, c_rt)

    out_ref[...] = out_root.astype(out_ref.dtype)


def fc_tree_net_forward(image_feature, node_label, indicator, params, *,
                        target_rows=None, compute_dtype=jnp.bfloat16):
    """image_feature: (B, P, img_dim); node_label: (B, 6, in_dim); indicator: (B, 1).
    Returns (B*P, img_dim) float32, matching FCTreeNet.forward."""
    B, P, img_dim = image_feature.shape
    _, six, in_dim = node_label.shape
    assert six == 6

    (wfc, bfc, wl, bl, wm, bm, wg, bg, wr, br) = params
    cdt = jnp.dtype(compute_dtype)

    # -------- generation-aware VMEM budget / tile sizing ---------------------
    try:
        vmem_cap = int(pltpu.get_tpu_info().vmem_capacity_bytes)   # 64 MiB v7x, 128 MiB v5e/v6e
    except Exception:
        vmem_cap = 128 * 1024 * 1024
    vmem_limit = min(int(0.75 * vmem_cap), 100 * 1024 * 1024)

    if target_rows is None:
        # ~ f32 intermediates + double-buffered f32 in/out per row.
        bytes_per_row = 72 * img_dim
        target_rows = max(P, min(2048, (vmem_limit // 2) // bytes_per_row))

    align = 16 if cdt == jnp.dtype(jnp.bfloat16) else 8
    b_tile = max(1, min(B, target_rows // max(P, 1)))
    if b_tile < B:
        b_tile = min(_round_up(b_tile, align), _round_up(B, align))
    B_pad = _round_up(B, b_tile)
    # v7x megacore: make sure the "parallel" grid axis has >= 2 steps when the
    # batch is big enough (costs nothing on single-TC v5e/v6e).
    if B >= 16 and B_pad // b_tile < 2:
        b_tile = max(align, ((b_tile // 2) // align) * align)
        B_pad = _round_up(B, b_tile)
    grid = (B_pad // b_tile,)

    def pad_b(x):
        if B_pad == B:
            return x
        return jnp.pad(x, [(0, B_pad - B)] + [(0, 0)] * (x.ndim - 1))

    # Inputs stay in their native f32 dtype in HBM (no full-array cast pre-pass);
    # the compute-dtype cast happens inside the kernel, hidden under compute.
    nodes = jnp.transpose(pad_b(node_label), (1, 0, 2))             # (6, B_pad, in)
    img = pad_b(image_feature).reshape(B_pad * P, img_dim)          # (B_pad*P, img)
    ind = pad_b(indicator).astype(jnp.float32)                      # (B_pad, 1)

    # Split each concat-Linear weight into node / feature halves; fuse the four
    # node halves along N so the kernel needs a single wide per-batch dot.
    def split(w):
        return w[:in_dim].astype(cdt), w[in_dim:].astype(cdt)

    wl_n, wl_f = split(wl)
    wm_n, wm_f = split(wm)
    wg_n, wg_f = split(wg)
    wr_n, wr_f = split(wr)
    wnode = jnp.concatenate([wl_n, wm_n, wg_n, wr_n], axis=1)       # (in, 4*img)

    def row(b):                               # biases as (1, D) f32 rows
        return b.reshape(1, -1).astype(jnp.float32)

    def const_spec(shape):
        # Grid-constant block: single-buffered (Mosaic keeps it resident).
        return pl.BlockSpec(shape, lambda i: tuple(0 for _ in shape),
                            pipeline_mode=pl.Buffered(1))

    in_specs = [
        pl.BlockSpec((6, b_tile, in_dim), lambda i: (0, i, 0)),       # node labels
        pl.BlockSpec((b_tile * P, img_dim), lambda i: (i, 0)),        # image feats
        pl.BlockSpec((b_tile, 1), lambda i: (i, 0)),                  # indicator
        const_spec((in_dim, in_dim)), const_spec((1, in_dim)),        # fc
        const_spec((in_dim, 4 * img_dim)),                            # fused node halves
        const_spec((img_dim, img_dim)), const_spec((1, img_dim)),     # leaf (feat)
        const_spec((img_dim, img_dim)), const_spec((1, img_dim)),     # middle (feat)
        const_spec((img_dim, img_dim)), const_spec((1, img_dim)),     # merge (feat)
        const_spec((img_dim, img_dim)), const_spec((1, img_dim)),     # root (feat)
    ]
    out_spec = pl.BlockSpec((b_tile * P, img_dim), lambda i: (i, 0))

    out = pl.pallas_call(
        fc_tree_net_kernel,
        out_shape=jax.ShapeDtypeStruct((B_pad * P, img_dim), jnp.float32),
        grid_spec=pltpu.PrefetchScalarGridSpec(
            num_scalar_prefetch=0,
            grid=grid,
            in_specs=in_specs,
            out_specs=out_spec,
        ),
        compiler_params=pltpu.CompilerParams(
            dimension_semantics=("parallel",),   # megacore-shardable on v7x
            vmem_limit_bytes=vmem_limit,
        ),
    )(nodes, img, ind,
      wfc.astype(cdt), row(bfc),
      wnode,
      wl_f, row(bl),
      wm_f, row(bm),
      wg_f, row(bg),
      wr_f, row(br))

    return out[:B * P]


def fc_tree_net_reference(image_feature, node_label, indicator, params):
    """Pure-JAX float32 reference replicating the PyTorch forward semantics."""
    B, P, img_dim = image_feature.shape
    in_dim = node_label.shape[-1]
    (wfc, bfc, wl, bl, wm, bm, wg, bg, wr, br) = params

    nl = node_label.reshape(-1, in_dim) @ wfc + bfc
    nl = nl.reshape(-1, 6, in_dim)
    nl = jnp.broadcast_to(nl[:, None], (B, P, 6, in_dim))
    ind = jnp.broadcast_to(indicator[:, None, :], (B, P, 1)).reshape(-1, 1)
    img = image_feature.reshape(-1, img_dim)

    def lin(x, w, b):
        return x @ w + b

    leaf_l = jnp.concatenate([nl[:, :, 3, :].reshape(-1, in_dim), img], -1)
    leaf_r = jnp.concatenate([nl[:, :, 5, :].reshape(-1, in_dim), img], -1)
    out_ll = jax.nn.relu(lin(leaf_l, wl, bl))
    out_lr = jax.nn.relu(lin(leaf_r, wl, bl))
    out_left = jax.nn.relu(
        lin(jnp.concatenate([nl[:, :, 2, :].reshape(-1, in_dim), out_ll], -1), wm, bm))
    out_right = jax.nn.relu(
        lin(jnp.concatenate([nl[:, :, 4, :].reshape(-1, in_dim), out_lr], -1), wm, bm))
    out_right = out_right * ind
    out_merge = jax.nn.relu(
        lin(jnp.concatenate([nl[:, :, 1, :].reshape(-1, in_dim),
                             out_left + out_right], -1), wg, bg))
    out_root = jax.nn.relu(
        lin(jnp.concatenate([nl[:, :, 0, :].reshape(-1, in_dim), out_merge], -1), wr, br))
    return out_root


def init_params(key, in_dim, img_dim):
    """Deterministic synthetic parameters; weights stored (in_features, out_features)
    so layers are x @ W + b (same semantics as the nn.Linear layers)."""
    keys = jax.random.split(key, 10)
    scale = 0.05

    def w(k, shape):
        return scale * jax.random.normal(k, shape, dtype=jnp.float32)

    wfc = w(keys[0], (in_dim, in_dim))
    bfc = w(keys[1], (in_dim,))
    wl = w(keys[2], (in_dim + img_dim, img_dim))
    bl = w(keys[3], (img_dim,))
    wm = w(keys[4], (in_dim + img_dim, img_dim))
    bm = w(keys[5], (img_dim,))
    wg = w(keys[6], (in_dim + img_dim, img_dim))
    bg = w(keys[7], (img_dim,))
    wr = w(keys[8], (in_dim + img_dim, img_dim))
    br = w(keys[9], (img_dim,))
    return (wfc, bfc, wl, bl, wm, bm, wg, bg, wr, br)


if __name__ == "__main__":
    master_key = jax.random.PRNGKey(0)

    def run_case(B, P, in_dim, img_dim, target_rows):
        k_img, k_node, k_ind, k_param = jax.random.split(
            jax.random.fold_in(master_key, B * 1000 + P), 4)
        image_feature = jax.random.normal(k_img, (B, P, img_dim), dtype=jnp.float32)
        node_label = jax.random.normal(k_node, (B, 6, in_dim), dtype=jnp.float32)
        indicator = (jax.random.uniform(k_ind, (B, 1)) > 0.5).astype(jnp.float32)
        params = init_params(k_param, in_dim, img_dim)

        ref = fc_tree_net_reference(image_feature, node_label, indicator, params)

        # float32 compute path: tight numerical check of the kernel algebra.
        out_f32 = jax.block_until_ready(
            fc_tree_net_forward(image_feature, node_label, indicator, params,
                                target_rows=target_rows,
                                compute_dtype=jnp.float32))
        assert out_f32.shape == (B * P, img_dim)
        assert jnp.allclose(out_f32, ref, atol=1e-4, rtol=1e-4), "f32 mismatch"

        # bf16 compute path (default, MXU-native): loose check.
        out_bf16 = jax.block_until_ready(
            fc_tree_net_forward(image_feature, node_label, indicator, params,
                                target_rows=target_rows))
        assert out_bf16.shape == (B * P, img_dim)
        assert jnp.allclose(out_bf16, ref, atol=1e-1, rtol=1e-1), "bf16 mismatch"

    # Tiny config: single grid step, per-role fallback for the fc/node dots.
    run_case(B=2, P=8, in_dim=128, img_dim=128, target_rows=512)
    # Multi-step grid with batch padding, fused node path, two-dot middle layer.
    run_case(B=40, P=16, in_dim=128, img_dim=256, target_rows=256)
    # Auto (VMEM-derived) tile, P not sublane-aligned -> broadcast fallback path.
    run_case(B=8, P=4, in_dim=128, img_dim=128, target_rows=None)

    print("KERNEL_OK")
</pallas_src>

<mosaic_0001>
module attributes {stable_mosaic.version = 11 : i64} {
  func.func @fc_tree_net_kernel(%arg0: i32, %arg1: memref<6x2x128xf32, #tpu.memory_space<vmem>>, %arg2: memref<16x128xf32, #tpu.memory_space<vmem>>, %arg3: memref<2x1xf32, #tpu.memory_space<vmem>>, %arg4: memref<128x128xf32, #tpu.memory_space<vmem>>, %arg5: memref<1x128xf32, #tpu.memory_space<vmem>>, %arg6: memref<128x512xf32, #tpu.memory_space<vmem>>, %arg7: memref<128x128xf32, #tpu.memory_space<vmem>>, %arg8: memref<1x128xf32, #tpu.memory_space<vmem>>, %arg9: memref<128x128xf32, #tpu.memory_space<vmem>>, %arg10: memref<1x128xf32, #tpu.memory_space<vmem>>, %arg11: memref<128x128xf32, #tpu.memory_space<vmem>>, %arg12: memref<1x128xf32, #tpu.memory_space<vmem>>, %arg13: memref<128x128xf32, #tpu.memory_space<vmem>>, %arg14: memref<1x128xf32, #tpu.memory_space<vmem>>, %arg15: memref<16x128xf32, #tpu.memory_space<vmem>>) attributes {dimension_semantics = [#tpu.dimension_semantics<parallel>], iteration_bounds = array<i64: 1>, scalar_prefetch = 0 : i64, scratch_operands = 0 : i64, tpu.core_type = #tpu.core_type<tc>, window_params = [{transform_indices = @transform_0, window_bounds = array<i64: 6, 2, 128>}, {transform_indices = @transform_1, window_bounds = array<i64: 16, 128>}, {transform_indices = @transform_2, window_bounds = array<i64: 2, 1>}, {pipeline_mode = #tpu.pipeline_mode<synchronous>, transform_indices = @transform_3, window_bounds = array<i64: 128, 128>}, {pipeline_mode = #tpu.pipeline_mode<synchronous>, transform_indices = @transform_4, window_bounds = array<i64: 1, 128>}, {pipeline_mode = #tpu.pipeline_mode<synchronous>, transform_indices = @transform_5, window_bounds = array<i64: 128, 512>}, {pipeline_mode = #tpu.pipeline_mode<synchronous>, transform_indices = @transform_6, window_bounds = array<i64: 128, 128>}, {pipeline_mode = #tpu.pipeline_mode<synchronous>, transform_indices = @transform_7, window_bounds = array<i64: 1, 128>}, {pipeline_mode = #tpu.pipeline_mode<synchronous>, transform_indices = @transform_8, window_bounds = array<i64: 128, 128>}, {pipeline_mode = #tpu.pipeline_mode<synchronous>, transform_indices = @transform_9, window_bounds = array<i64: 1, 128>}, {pipeline_mode = #tpu.pipeline_mode<synchronous>, transform_indices = @transform_10, window_bounds = array<i64: 128, 128>}, {pipeline_mode = #tpu.pipeline_mode<synchronous>, transform_indices = @transform_11, window_bounds = array<i64: 1, 128>}, {pipeline_mode = #tpu.pipeline_mode<synchronous>, transform_indices = @transform_12, window_bounds = array<i64: 128, 128>}, {pipeline_mode = #tpu.pipeline_mode<synchronous>, transform_indices = @transform_13, window_bounds = array<i64: 1, 128>}, {transform_indices = @transform_14, window_bounds = array<i64: 16, 128>}]} {
    %c0 = arith.constant 0 : index
    %c0_0 = arith.constant 0 : index
    %0 = vector.load %arg4[%c0, %c0_0] : memref<128x128xf32, #tpu.memory_space<vmem>>, vector<128x128xf32>
    %c0_1 = arith.constant 0 : index
    %c0_2 = arith.constant 0 : index
    %1 = vector.load %arg5[%c0_1, %c0_2] : memref<1x128xf32, #tpu.memory_space<vmem>>, vector<1x128xf32>
    %c0_3 = arith.constant 0 : index
    %c0_4 = arith.constant 0 : index
    %2 = vector.load %arg6[%c0_3, %c0_4] : memref<128x512xf32, #tpu.memory_space<vmem>>, vector<128x512xf32>
    %c0_5 = arith.constant 0 : index
    %c0_6 = arith.constant 0 : index
    %c0_7 = arith.constant 0 : index
    %3 = vector.load %arg1[%c0_5, %c0_6, %c0_7] : memref<6x2x128xf32, #tpu.memory_space<vmem>>, vector<1x2x128xf32>
    %4 = vector.shape_cast %3 : vector<1x2x128xf32> to vector<2x128xf32>
    %cst = arith.constant dense<0.000000e+00> : vector<2x128xf32>
    %5 = tpu.matmul %4, %0, %cst {dimension_numbers = #tpu.dot_dimension_numbers<[1], [0], [0], [1], [0, 0, 1, 1], [], []>} : vector<2x128xf32>, vector<128x128xf32>, vector<2x128xf32> -> vector<2x128xf32>
    %6 = vector.broadcast %1 : vector<1x128xf32> to vector<2x128xf32>
    %7 = arith.addf %5, %6 : vector<2x128xf32>
    %c1 = arith.constant 1 : index
    %c0_8 = arith.constant 0 : index
    %c0_9 = arith.constant 0 : index
    %8 = vector.load %arg1[%c1, %c0_8, %c0_9] : memref<6x2x128xf32, #tpu.memory_space<vmem>>, vector<1x2x128xf32>
    %9 = vector.shape_cast %8 : vector<1x2x128xf32> to vector<2x128xf32>
    %cst_10 = arith.constant dense<0.000000e+00> : vector<2x128xf32>
    %10 = tpu.matmul %9, %0, %cst_10 {dimension_numbers = #tpu.dot_dimension_numbers<[1], [0], [0], [1], [0, 0, 1, 1], [], []>} : vector<2x128xf32>, vector<128x128xf32>, vector<2x128xf32> -> vector<2x128xf32>
    %11 = vector.broadcast %1 : vector<1x128xf32> to vector<2x128xf32>
    %12 = arith.addf %10, %11 : vector<2x128xf32>
    %c2 = arith.constant 2 : index
    %c0_11 = arith.constant 0 : index
    %c0_12 = arith.constant 0 : index
    %13 = vector.load %arg1[%c2, %c0_11, %c0_12] : memref<6x2x128xf32, #tpu.memory_space<vmem>>, vector<1x2x128xf32>
    %14 = vector.shape_cast %13 : vector<1x2x128xf32> to vector<2x128xf32>
    %cst_13 = arith.constant dense<0.000000e+00> : vector<2x128xf32>
    %15 = tpu.matmul %14, %0, %cst_13 {dimension_numbers = #tpu.dot_dimension_numbers<[1], [0], [0], [1], [0, 0, 1, 1], [], []>} : vector<2x128xf32>, vector<128x128xf32>, vector<2x128xf32> -> vector<2x128xf32>
    %16 = vector.broadcast %1 : vector<1x128xf32> to vector<2x128xf32>
    %17 = arith.addf %15, %16 : vector<2x128xf32>
    %c3 = arith.constant 3 : index
    %c0_14 = arith.constant 0 : index
    %c0_15 = arith.constant 0 : index
    %18 = vector.load %arg1[%c3, %c0_14, %c0_15] : memref<6x2x128xf32, #tpu.memory_space<vmem>>, vector<1x2x128xf32>
    %19 = vector.shape_cast %18 : vector<1x2x128xf32> to vector<2x128xf32>
    %cst_16 = arith.constant dense<0.000000e+00> : vector<2x128xf32>
    %20 = tpu.matmul %19, %0, %cst_16 {dimension_numbers = #tpu.dot_dimension_numbers<[1], [0], [0], [1], [0, 0, 1, 1], [], []>} : vector<2x128xf32>, vector<128x128xf32>, vector<2x128xf32> -> vector<2x128xf32>
    %21 = vector.broadcast %1 : vector<1x128xf32> to vector<2x128xf32>
    %22 = arith.addf %20, %21 : vector<2x128xf32>
    %c4 = arith.constant 4 : index
    %c0_17 = arith.constant 0 : index
    %c0_18 = arith.constant 0 : index
    %23 = vector.load %arg1[%c4, %c0_17, %c0_18] : memref<6x2x128xf32, #tpu.memory_space<vmem>>, vector<1x2x128xf32>
    %24 = vector.shape_cast %23 : vector<1x2x128xf32> to vector<2x128xf32>
    %cst_19 = arith.constant dense<0.000000e+00> : vector<2x128xf32>
    %25 = tpu.matmul %24, %0, %cst_19 {dimension_numbers = #tpu.dot_dimension_numbers<[1], [0], [0], [1], [0, 0, 1, 1], [], []>} : vector<2x128xf32>, vector<128x128xf32>, vector<2x128xf32> -> vector<2x128xf32>
    %26 = vector.broadcast %1 : vector<1x128xf32> to vector<2x128xf32>
    %27 = arith.addf %25, %26 : vector<2x128xf32>
    %c5 = arith.constant 5 : index
    %c0_20 = arith.constant 0 : index
    %c0_21 = arith.constant 0 : index
    %28 = vector.load %arg1[%c5, %c0_20, %c0_21] : memref<6x2x128xf32, #tpu.memory_space<vmem>>, vector<1x2x128xf32>
    %29 = vector.shape_cast %28 : vector<1x2x128xf32> to vector<2x128xf32>
    %cst_22 = arith.constant dense<0.000000e+00> : vector<2x128xf32>
    %30 = tpu.matmul %29, %0, %cst_22 {dimension_numbers = #tpu.dot_dimension_numbers<[1], [0], [0], [1], [0, 0, 1, 1], [], []>} : vector<2x128xf32>, vector<128x128xf32>, vector<2x128xf32> -> vector<2x128xf32>
    %31 = vector.broadcast %1 : vector<1x128xf32> to vector<2x128xf32>
    %32 = arith.addf %30, %31 : vector<2x128xf32>
    %cst_23 = arith.constant dense<0.000000e+00> : vector<2x512xf32>
    %33 = tpu.matmul %7, %2, %cst_23 {dimension_numbers = #tpu.dot_dimension_numbers<[1], [0], [0], [1], [0, 0, 1, 1], [], []>} : vector<2x128xf32>, vector<128x512xf32>, vector<2x512xf32> -> vector<2x512xf32>
    %cst_24 = arith.constant dense<0.000000e+00> : vector<2x512xf32>
    %34 = tpu.matmul %12, %2, %cst_24 {dimension_numbers = #tpu.dot_dimension_numbers<[1], [0], [0], [1], [0, 0, 1, 1], [], []>} : vector<2x128xf32>, vector<128x512xf32>, vector<2x512xf32> -> vector<2x512xf32>
    %cst_25 = arith.constant dense<0.000000e+00> : vector<2x512xf32>
    %35 = tpu.matmul %17, %2, %cst_25 {dimension_numbers = #tpu.dot_dimension_numbers<[1], [0], [0], [1], [0, 0, 1, 1], [], []>} : vector<2x128xf32>, vector<128x512xf32>, vector<2x512xf32> -> vector<2x512xf32>
    %cst_26 = arith.constant dense<0.000000e+00> : vector<2x512xf32>
    %36 = tpu.matmul %22, %2, %cst_26 {dimension_numbers = #tpu.dot_dimension_numbers<[1], [0], [0], [1], [0, 0, 1, 1], [], []>} : vector<2x128xf32>, vector<128x512xf32>, vector<2x512xf32> -> vector<2x512xf32>
    %cst_27 = arith.constant dense<0.000000e+00> : vector<2x512xf32>
    %37 = tpu.matmul %27, %2, %cst_27 {dimension_numbers = #tpu.dot_dimension_numbers<[1], [0], [0], [1], [0, 0, 1, 1], [], []>} : vector<2x128xf32>, vector<128x512xf32>, vector<2x512xf32> -> vector<2x512xf32>
    %cst_28 = arith.constant dense<0.000000e+00> : vector<2x512xf32>
    %38 = tpu.matmul %32, %2, %cst_28 {dimension_numbers = #tpu.dot_dimension_numbers<[1], [0], [0], [1], [0, 0, 1, 1], [], []>} : vector<2x128xf32>, vector<128x512xf32>, vector<2x512xf32> -> vector<2x512xf32>
    %c0_29 = arith.constant 0 : index
    %c0_30 = arith.constant 0 : index
    %39 = vector.load %arg8[%c0_29, %c0_30] : memref<1x128xf32, #tpu.memory_space<vmem>>, vector<1x128xf32>
    %c0_31 = arith.constant 0 : index
    %c0_32 = arith.constant 0 : index
    %40 = vector.load %arg10[%c0_31, %c0_32] : memref<1x128xf32, #tpu.memory_space<vmem>>, vector<1x128xf32>
    %c0_33 = arith.constant 0 : index
    %c0_34 = arith.constant 0 : index
    %41 = vector.load %arg12[%c0_33, %c0_34] : memref<1x128xf32, #tpu.memory_space<vmem>>, vector<1x128xf32>
    %c0_35 = arith.constant 0 : index
    %c0_36 = arith.constant 0 : index
    %42 = vector.load %arg14[%c0_35, %c0_36] : memref<1x128xf32, #tpu.memory_space<vmem>>, vector<1x128xf32>
    %43 = vector.extract_strided_slice %36 {offsets = [0, 0], sizes = [2, 128], strides = [1, 1]} : vector<2x512xf32> to vector<2x128xf32>
    %44 = vector.broadcast %39 : vector<1x128xf32> to vector<2x128xf32>
    %45 = arith.addf %43, %44 : vector<2x128xf32>
    %46 = vector.extract_strided_slice %38 {offsets = [0, 0], sizes = [2, 128], strides = [1, 1]} : vector<2x512xf32> to vector<2x128xf32>
    %47 = vector.broadcast %39 : vector<1x128xf32> to vector<2x128xf32>
    %48 = arith.addf %46, %47 : vector<2x128xf32>
    %49 = vector.extract_strided_slice %35 {offsets = [0, 128], sizes = [2, 128], strides = [1, 1]} : vector<2x512xf32> to vector<2x128xf32>
    %50 = vector.broadcast %40 : vector<1x128xf32> to vector<2x128xf32>
    %51 = arith.addf %49, %50 : vector<2x128xf32>
    %52 = vector.extract_strided_slice %37 {offsets = [0, 128], sizes = [2, 128], strides = [1, 1]} : vector<2x512xf32> to vector<2x128xf32>
    %53 = vector.broadcast %40 : vector<1x128xf32> to vector<2x128xf32>
    %54 = arith.addf %52, %53 : vector<2x128xf32>
    %55 = vector.extract_strided_slice %34 {offsets = [0, 256], sizes = [2, 128], strides = [1, 1]} : vector<2x512xf32> to vector<2x128xf32>
    %56 = vector.broadcast %41 : vector<1x128xf32> to vector<2x128xf32>
    %57 = arith.addf %55, %56 : vector<2x128xf32>
    %58 = vector.extract_strided_slice %33 {offsets = [0, 384], sizes = [2, 128], strides = [1, 1]} : vector<2x512xf32> to vector<2x128xf32>
    %59 = vector.broadcast %42 : vector<1x128xf32> to vector<2x128xf32>
    %60 = arith.addf %58, %59 : vector<2x128xf32>
    %c0_37 = arith.constant 0 : index
    %c0_38 = arith.constant 0 : index
    %61 = vector.load %arg2[%c0_37, %c0_38] : memref<16x128xf32, #tpu.memory_space<vmem>>, vector<16x128xf32>
    %c0_39 = arith.constant 0 : index
    %c0_40 = arith.constant 0 : index
    %62 = vector.load %arg7[%c0_39, %c0_40] : memref<128x128xf32, #tpu.memory_space<vmem>>, vector<128x128xf32>
    %c0_41 = arith.constant 0 : index
    %c0_42 = arith.constant 0 : index
    %63 = vector.load %arg9[%c0_41, %c0_42] : memref<128x128xf32, #tpu.memory_space<vmem>>, vector<128x128xf32>
    %c0_43 = arith.constant 0 : index
    %c0_44 = arith.constant 0 : index
    %64 = vector.load %arg11[%c0_43, %c0_44] : memref<128x128xf32, #tpu.memory_space<vmem>>, vector<128x128xf32>
    %c0_45 = arith.constant 0 : index
    %c0_46 = arith.constant 0 : index
    %65 = vector.load %arg13[%c0_45, %c0_46] : memref<128x128xf32, #tpu.memory_space<vmem>>, vector<128x128xf32>
    %c0_47 = arith.constant 0 : index
    %c0_48 = arith.constant 0 : index
    %66 = vector.load %arg3[%c0_47, %c0_48] : memref<2x1xf32, #tpu.memory_space<vmem>>, vector<2x1xf32>
    %cst_49 = arith.constant dense<0.000000e+00> : vector<16x128xf32>
    %67 = tpu.matmul %61, %62, %cst_49 {dimension_numbers = #tpu.dot_dimension_numbers<[1], [0], [0], [1], [0, 0, 1, 1], [], []>} : vector<16x128xf32>, vector<128x128xf32>, vector<16x128xf32> -> vector<16x128xf32>
    %68 = vector.shape_cast %67 : vector<16x128xf32> to vector<2x8x128xf32>
    %69 = vector.shape_cast %45 : vector<2x128xf32> to vector<2x1x128xf32>
    %70 = vector.broadcast %69 : vector<2x1x128xf32> to vector<2x8x128xf32>
    %71 = arith.addf %68, %70 : vector<2x8x128xf32>
    %cst_50 = arith.constant 0.000000e+00 : f32
    %72 = vector.broadcast %cst_50 : f32 to vector<2x8x128xf32>
    %73 = arith.maximumf %71, %72 : vector<2x8x128xf32>
    %74 = vector.shape_cast %73 : vector<2x8x128xf32> to vector<16x128xf32>
    %75 = vector.shape_cast %67 : vector<16x128xf32> to vector<2x8x128xf32>
    %76 = vector.shape_cast %48 : vector<2x128xf32> to vector<2x1x128xf32>
    %77 = vector.broadcast %76 : vector<2x1x128xf32> to vector<2x8x128xf32>
    %78 = arith.addf %75, %77 : vector<2x8x128xf32>
    %cst_51 = arith.constant 0.000000e+00 : f32
    %79 = vector.broadcast %cst_51 : f32 to vector<2x8x128xf32>
    %80 = arith.maximumf %78, %79 : vector<2x8x128xf32>
    %81 = vector.shape_cast %80 : vector<2x8x128xf32> to vector<16x128xf32>
    %82 = tpu.concatenate %74, %81 in 0 : vector<16x128xf32>, vector<16x128xf32> -> vector<32x128xf32>
    %cst_52 = arith.constant dense<0.000000e+00> : vector<32x128xf32>
    %83 = tpu.matmul %82, %63, %cst_52 {dimension_numbers = #tpu.dot_dimension_numbers<[1], [0], [0], [1], [0, 0, 1, 1], [], []>} : vector<32x128xf32>, vector<128x128xf32>, vector<32x128xf32> -> vector<32x128xf32>
    %84 = vector.extract_strided_slice %83 {offsets = [0, 0], sizes = [16, 128], strides = [1, 1]} : vector<32x128xf32> to vector<16x128xf32>
    %85 = vector.extract_strided_slice %83 {offsets = [16, 0], sizes = [16, 128], strides = [1, 1]} : vector<32x128xf32> to vector<16x128xf32>
    %86 = vector.shape_cast %84 : vector<16x128xf32> to vector<2x8x128xf32>
    %87 = vector.shape_cast %51 : vector<2x128xf32> to vector<2x1x128xf32>
    %88 = vector.broadcast %87 : vector<2x1x128xf32> to vector<2x8x128xf32>
    %89 = arith.addf %86, %88 : vector<2x8x128xf32>
    %cst_53 = arith.constant 0.000000e+00 : f32
    %90 = vector.broadcast %cst_53 : f32 to vector<2x8x128xf32>
    %91 = arith.maximumf %89, %90 : vector<2x8x128xf32>
    %92 = vector.shape_cast %91 : vector<2x8x128xf32> to vector<16x128xf32>
    %93 = vector.shape_cast %85 : vector<16x128xf32> to vector<2x8x128xf32>
    %94 = vector.shape_cast %54 : vector<2x128xf32> to vector<2x1x128xf32>
    %95 = vector.broadcast %94 : vector<2x1x128xf32> to vector<2x8x128xf32>
    %96 = arith.addf %93, %95 : vector<2x8x128xf32>
    %cst_54 = arith.constant 0.000000e+00 : f32
    %97 = vector.broadcast %cst_54 : f32 to vector<2x8x128xf32>
    %98 = arith.maximumf %96, %97 : vector<2x8x128xf32>
    %99 = vector.shape_cast %66 : vector<2x1xf32> to vector<2x1x1xf32>
    %100 = vector.broadcast %99 : vector<2x1x1xf32> to vector<2x8x128xf32>
    %101 = arith.mulf %98, %100 : vector<2x8x128xf32>
    %102 = vector.shape_cast %101 : vector<2x8x128xf32> to vector<16x128xf32>
    %103 = arith.addf %92, %102 : vector<16x128xf32>
    %cst_55 = arith.constant dense<0.000000e+00> : vector<16x128xf32>
    %104 = tpu.matmul %103, %64, %cst_55 {dimension_numbers = #tpu.dot_dimension_numbers<[1], [0], [0], [1], [0, 0, 1, 1], [], []>} : vector<16x128xf32>, vector<128x128xf32>, vector<16x128xf32> -> vector<16x128xf32>
    %105 = vector.shape_cast %104 : vector<16x128xf32> to vector<2x8x128xf32>
    %106 = vector.shape_cast %57 : vector<2x128xf32> to vector<2x1x128xf32>
    %107 = vector.broadcast %106 : vector<2x1x128xf32> to vector<2x8x128xf32>
    %108 = arith.addf %105, %107 : vector<2x8x128xf32>
    %cst_56 = arith.constant 0.000000e+00 : f32
    %109 = vector.broadcast %cst_56 : f32 to vector<2x8x128xf32>
    %110 = arith.maximumf %108, %109 : vector<2x8x128xf32>
    %111 = vector.shape_cast %110 : vector<2x8x128xf32> to vector<16x128xf32>
    %cst_57 = arith.constant dense<0.000000e+00> : vector<16x128xf32>
    %112 = tpu.matmul %111, %65, %cst_57 {dimension_numbers = #tpu.dot_dimension_numbers<[1], [0], [0], [1], [0, 0, 1, 1], [], []>} : vector<16x128xf32>, vector<128x128xf32>, vector<16x128xf32> -> vector<16x128xf32>
    %113 = vector.shape_cast %112 : vector<16x128xf32> to vector<2x8x128xf32>
    %114 = vector.shape_cast %60 : vector<2x128xf32> to vector<2x1x128xf32>
    %115 = vector.broadcast %114 : vector<2x1x128xf32> to vector<2x8x128xf32>
    %116 = arith.addf %113, %115 : vector<2x8x128xf32>
    %cst_58 = arith.constant 0.000000e+00 : f32
    %117 = vector.broadcast %cst_58 : f32 to vector<2x8x128xf32>
    %118 = arith.maximumf %116, %117 : vector<2x8x128xf32>
    %119 = vector.shape_cast %118 : vector<2x8x128xf32> to vector<16x128xf32>
    %c0_59 = arith.constant 0 : index
    %c0_60 = arith.constant 0 : index
    %120 = vector.load %arg15[%c0_59, %c0_60] : memref<16x128xf32, #tpu.memory_space<vmem>>, vector<16x128xf32>
    tpu.vector_store %arg15[%c0_59, %c0_60], %119 {strides = array<i32>} : memref<16x128xf32, #tpu.memory_space<vmem>>, vector<16x128xf32>,
    return
  }
  func.func @transform_0(%arg0: i32) -> (i32, i32, i32) {
    %c0_i32 = arith.constant 0 : i32
    %c0_i32_0 = arith.constant 0 : i32
    %c0_i32_1 = arith.constant 0 : i32
    return %c0_i32, %arg0, %c0_i32_0 : i32, i32, i32
  }
  func.func @transform_1(%arg0: i32) -> (i32, i32) {
    %c0_i32 = arith.constant 0 : i32
    %c0_i32_0 = arith.constant 0 : i32
    return %arg0, %c0_i32 : i32, i32
  }
  func.func @transform_2(%arg0: i32) -> (i32, i32) {
    %c0_i32 = arith.constant 0 : i32
    %c0_i32_0 = arith.constant 0 : i32
    return %arg0, %c0_i32 : i32, i32
  }
  func.func @transform_3(%arg0: i32) -> (i32, i32) {
    %c0_i32 = arith.constant 0 : i32
    %c0_i32_0 = arith.constant 0 : i32
    %c0_i32_1 = arith.constant 0 : i32
    return %c0_i32, %c0_i32_0 : i32, i32
  }
  func.func @transform_4(%arg0: i32) -> (i32, i32) {
    %c0_i32 = arith.constant 0 : i32
    %c0_i32_0 = arith.constant 0 : i32
    %c0_i32_1 = arith.constant 0 : i32
    return %c0_i32, %c0_i32_0 : i32, i32
  }
  func.func @transform_5(%arg0: i32) -> (i32, i32) {
    %c0_i32 = arith.constant 0 : i32
    %c0_i32_0 = arith.constant 0 : i32
    %c0_i32_1 = arith.constant 0 : i32
    return %c0_i32, %c0_i32_0 : i32, i32
  }
  func.func @transform_6(%arg0: i32) -> (i32, i32) {
    %c0_i32 = arith.constant 0 : i32
    %c0_i32_0 = arith.constant 0 : i32
    %c0_i32_1 = arith.constant 0 : i32
    return %c0_i32, %c0_i32_0 : i32, i32
  }
  func.func @transform_7(%arg0: i32) -> (i32, i32) {
    %c0_i32 = arith.constant 0 : i32
    %c0_i32_0 = arith.constant 0 : i32
    %c0_i32_1 = arith.constant 0 : i32
    return %c0_i32, %c0_i32_0 : i32, i32
  }
  func.func @transform_8(%arg0: i32) -> (i32, i32) {
    %c0_i32 = arith.constant 0 : i32
    %c0_i32_0 = arith.constant 0 : i32
    %c0_i32_1 = arith.constant 0 : i32
    return %c0_i32, %c0_i32_0 : i32, i32
  }
  func.func @transform_9(%arg0: i32) -> (i32, i32) {
    %c0_i32 = arith.constant 0 : i32
    %c0_i32_0 = arith.constant 0 : i32
    %c0_i32_1 = arith.constant 0 : i32
    return %c0_i32, %c0_i32_0 : i32, i32
  }
  func.func @transform_10(%arg0: i32) -> (i32, i32) {
    %c0_i32 = arith.constant 0 : i32
    %c0_i32_0 = arith.constant 0 : i32
    %c0_i32_1 = arith.constant 0 : i32
    return %c0_i32, %c0_i32_0 : i32, i32
  }
  func.func @transform_11(%arg0: i32) -> (i32, i32) {
    %c0_i32 = arith.constant 0 : i32
    %c0_i32_0 = arith.constant 0 : i32
    %c0_i32_1 = arith.constant 0 : i32
    return %c0_i32, %c0_i32_0 : i32, i32
  }
  func.func @transform_12(%arg0: i32) -> (i32, i32) {
    %c0_i32 = arith.constant 0 : i32
    %c0_i32_0 = arith.constant 0 : i32
    %c0_i32_1 = arith.constant 0 : i32
    return %c0_i32, %c0_i32_0 : i32, i32
  }
  func.func @transform_13(%arg0: i32) -> (i32, i32) {
    %c0_i32 = arith.constant 0 : i32
    %c0_i32_0 = arith.constant 0 : i32
    %c0_i32_1 = arith.constant 0 : i32
    return %c0_i32, %c0_i32_0 : i32, i32
  }
  func.func @transform_14(%arg0: i32) -> (i32, i32) {
    %c0_i32 = arith.constant 0 : i32
    %c0_i32_0 = arith.constant 0 : i32
    return %arg0, %c0_i32 : i32, i32
  }
}

</mosaic_0001>

<bundles_post_ra>
// kernel: tpu_custom_call.1
= control target key start
LH: loop header
LB: loop body
LE: loop exit
PB: predicated region body
PF: predicated region fallthrough
CT: control target
= control target key end

     0   :  { %19 = vsyncpa [#allocation3], 0  ;;  %s3799_s0 = inlined_call_operand.hbm [shape: f32[6,2,128], index: 0, kind: input, shape index: {}]   ;;  %s3800_s1 = inlined_call_operand.hbm [shape: f32[16,128], index: 1, kind: input, shape index: {}]   ;;  %s3801_s2 = inlined_call_operand.hbm [shape: f32[2,1], index: 2, kind: input, shape index: {}]   ;;  %s3802_s3 = inlined_call_operand.hbm [shape: f32[128,128], index: 3, kind: input, shape index: {}]   ;;  %s3803_s4 = inlined_call_operand.hbm [shape: f32[1,128], index: 4, kind: input, shape index: {}]   ;;  %s3804_s5 = inlined_call_operand.hbm [shape: f32[128,512], index: 5, kind: input, shape index: {}]   ;;  %s3805_s6 = inlined_call_operand.hbm [shape: f32[128,128], index: 6, kind: input, shape index: {}]   ;;  %s3806_s7 = inlined_call_operand.hbm [shape: f32[1,128], index: 7, kind: input, shape index: {}]   ;;  %s3807_s8 = inlined_call_operand.hbm [shape: f32[128,128], index: 8, kind: input, shape index: {}]   ;;  %s3808_s9 = inlined_call_operand.hbm [shape: f32[1,128], index: 9, kind: input, shape index: {}]   ;;  %s3809_s10 = inlined_call_operand.hbm [shape: f32[128,128], index: 10, kind: input, shape index: {}]   ;;  %s3810_s11 = inlined_call_operand.hbm [shape: f32[1,128], index: 11, kind: input, shape index: {}]   ;;  %s3811_s12 = inlined_call_operand.hbm [shape: f32[128,128], index: 12, kind: input, shape index: {}]   ;;  %s3812_s13 = inlined_call_operand.hbm [shape: f32[1,128], index: 13, kind: input, shape index: {}]   ;;  %s3813_s14 = inlined_call_operand.hbm [shape: f32[16,128], index: 14, kind: output, shape index: {}]  }
   0x1   :  { %20 = vsyncpa [#allocation6], 0 }
   0x2   :  { %21 = vsyncpa [#allocation9], 0 }
   0x3   :  { %22 = vsyncpa [#allocation12], 0 }
   0x4   :  { %23 = vsyncpa [#allocation15], 0 }
   0x5   :  { %24 = vsyncpa [#allocation18], 0 }
   0x6   :  { %25 = vsyncpa [#allocation21], 0 }
   0x7   :  { %26 = vsyncpa [#allocation24], 0 }
   0x8   :  { %27 = vsyncpa [#allocation4], 0  ;;  %s3239_s29 = smov [#allocation5]   ;;  %s2891_s17 = scalar_lea.hbm %s3800_s1, 256 }
   0x9   :  { %s45_s30 = sshll.u32 %s3239_s29, 4  ;;  %p2892_p0 = scmp.ne.s32.totalorder %s3800_s1, %s2891_s17  ;;  %s46_s30 = int_to_ptr.vmem [resolvable:$true] %s45_s30 }
   0xa   :  { %p2895_p1 = scmp.lt.u32.totalorder %s2891_s17, %s3800_s1 }
   0xc   :  { %p2897_p2 = pnand %p2895_p1, %p2892_p0 }
   0xe   :  { %2900 = shalt.err (!%p2897_p2)
}
   0xf   :  { %s2901_s22 = scalar_lea.vmem %s46_s30, 256  ;;  %p2906_p4 = scmp.lt.s32.totalorder %s46_s30, %s46_s30 }
  0x10   :  { %p2902_p3 = scmp.ne.s32.totalorder %s46_s30, %s2901_s22  ;;  %p2907_p5 = scmp.lt.s32.totalorder %s2901_s22, %s2901_s22 }
  0x12   :  { %p2908_p6 = por %p2907_p5, %p2906_p4 }
  0x14   :  { %p2909_p7 = pnand %p2908_p6, %p2902_p3 }
  0x16   :  { %2912 = shalt.err (!%p2909_p7)
}
  0x17   :  { %s3240_s23 = smov 128   ;;  %s3241_s24 = smov 8  }
  0x18   :  { %51 = dma.hbm_to_vmem [thread:$0]  %s3800_s1, 256, %s46_s30, [#allocation6], %s3240_s23, %s3240_s23, %s3241_s24  }
  0x19   :  { %s3242_s27 = smov [#allocation8]   ;;  %s2913_s16 = scalar_lea.hbm %s3802_s3, 2048 }
  0x1a   :  { %s67_s28 = sshll.u32 %s3242_s27, 4  ;;  %p2914_p8 = scmp.ne.s32.totalorder %s3802_s3, %s2913_s16  ;;  %s68_s28 = int_to_ptr.vmem [resolvable:$true] %s67_s28 }
  0x1b   :  { %p2917_p9 = scmp.lt.u32.totalorder %s2913_s16, %s3802_s3 }
  0x1d   :  { %p2919_p10 = pnand %p2917_p9, %p2914_p8 }
  0x1f   :  { %2922 = shalt.err (!%p2919_p10)
}
  0x20   :  { %s2923_s21 = scalar_lea.vmem %s68_s28, 2048  ;;  %p2928_p12 = scmp.lt.s32.totalorder %s68_s28, %s68_s28 }
  0x21   :  { %p2924_p11 = scmp.ne.s32.totalorder %s68_s28, %s2923_s21  ;;  %p2929_p13 = scmp.lt.s32.totalorder %s2923_s21, %s2923_s21 }
  0x23   :  { %p2930_p0 = por %p2929_p13, %p2928_p12 }
  0x25   :  { %p2931_p1 = pnand %p2930_p0, %p2924_p11 }
  0x27   :  { %2934 = shalt.err (!%p2931_p1)
}
  0x28   :  { %73 = dma.hbm_to_vmem [thread:$0]  %s3802_s3, 2048, %s68_s28, [#allocation9], %s3240_s23, %s3240_s23, %s3241_s24  }
  0x29   :  { %s3243_s22 = smov [#allocation11]   ;;  %s2935_s29 = scalar_lea.hbm %s3804_s5, 8192 }
  0x2a   :  { %s89_s25 = sshll.u32 %s3243_s22, 4  ;;  %p2936_p2 = scmp.ne.s32.totalorder %s3804_s5, %s2935_s29  ;;  %s90_s25 = int_to_ptr.vmem [resolvable:$true] %s89_s25 }
  0x2b   :  { %p2939_p3 = scmp.lt.u32.totalorder %s2935_s29, %s3804_s5 }
  0x2d   :  { %p2941_p4 = pnand %p2939_p3, %p2936_p2 }
  0x2f   :  { %2944 = shalt.err (!%p2941_p4)
}
  0x30   :  { %s2945_s19 = scalar_lea.vmem %s90_s25, 8192  ;;  %p2950_p6 = scmp.lt.s32.totalorder %s90_s25, %s90_s25 }
  0x31   :  { %p2946_p5 = scmp.ne.s32.totalorder %s90_s25, %s2945_s19  ;;  %p2951_p7 = scmp.lt.s32.totalorder %s2945_s19, %s2945_s19 }
  0x33   :  { %p2952_p8 = por %p2951_p7, %p2950_p6 }
  0x35   :  { %p2953_p9 = pnand %p2952_p8, %p2946_p5 }
  0x37   :  { %2956 = shalt.err (!%p2953_p9)
}
  0x38   :  { %s3244_s3 = smov 512   ;;  %s3245_s28 = smov 32  }
  0x39   :  { %95 = dma.hbm_to_vmem [thread:$0]  %s3804_s5, 8192, %s90_s25, [#allocation12], %s3244_s3, %s3244_s3, %s3245_s28  }
  0x3a   :  { %s3246_s1 = smov [#allocation14]   ;;  %s3247_s22 = smov [#allocation17]  }
  0x3b   :  { %s114_s30 = sshll.u32 %s3246_s1, 4  ;;  %s136_s26 = sshll.u32 %s3247_s22, 4  ;;  %s115_s30 = int_to_ptr.vmem [resolvable:$true] %s114_s30  ;;  %s137_s26 = int_to_ptr.vmem [resolvable:$true] %s136_s26 }
  0x3c   :  { %s2957_s15 = scalar_lea.hbm %s3806_s7, 16 }
  0x3d   :  { %p2958_p10 = scmp.ne.s32.totalorder %s3806_s7, %s2957_s15  ;;  %p2961_p11 = scmp.lt.u32.totalorder %s2957_s15, %s3806_s7 }
  0x3f   :  { %p2963_p12 = pnand %p2961_p11, %p2958_p10 }
  0x41   :  { %2966 = shalt.err (!%p2963_p12)
}
  0x42   :  { %s2967_s5 = scalar_lea.vmem %s115_s30, 16  ;;  %s2971_s25 = scalar_lea.vmem %s115_s30, 32 }
  0x43   :  { %p2968_p13 = scmp.ne.s32.totalorder %s115_s30, %s2967_s5  ;;  %p2972_p0 = scmp.lt.s32.totalorder %s115_s30, %s115_s30 }
  0x44   :  { %p2973_p1 = scmp.lt.s32.totalorder %s2971_s25, %s2967_s5 }
  0x46   :  { %p2974_p2 = por %p2973_p1, %p2972_p0 }
  0x48   :  { %p2975_p3 = pnand %p2974_p2, %p2968_p13 }
  0x4a   :  { %2978 = shalt.err (!%p2975_p3)
}
  0x4b   :  { %117 = dma.hbm_to_vmem [thread:$0]  %s3806_s7, 16, %s115_s30, [#allocation15]  }
  0x4c   :  { %s2979_s22 = scalar_lea.hbm %s3808_s9, 16 }
  0x4d   :  { %p2980_p4 = scmp.ne.s32.totalorder %s3808_s9, %s2979_s22  ;;  %p2983_p5 = scmp.lt.u32.totalorder %s2979_s22, %s3808_s9 }
  0x4f   :  { %p2985_p6 = pnand %p2983_p5, %p2980_p4 }
  0x51   :  { %2988 = shalt.err (!%p2985_p6)
}
  0x52   :  { %s2989_s17 = scalar_lea.vmem %s137_s26, 16  ;;  %s2993_s18 = scalar_lea.vmem %s137_s26, 32 }
  0x53   :  { %p2990_p7 = scmp.ne.s32.totalorder %s137_s26, %s2989_s17  ;;  %p2994_p8 = scmp.lt.s32.totalorder %s137_s26, %s137_s26 }
  0x54   :  { %p2995_p9 = scmp.lt.s32.totalorder %s2993_s18, %s2989_s17 }
  0x56   :  { %p2996_p10 = por %p2995_p9, %p2994_p8 }
  0x58   :  { %p2997_p11 = pnand %p2996_p10, %p2990_p7 }
  0x5a   :  { %3000 = shalt.err (!%p2997_p11)
}
  0x5b   :  { %139 = dma.hbm_to_vmem [thread:$0]  %s3808_s9, 16, %s137_s26, [#allocation18]  }
  0x5c   :  { %s3248_s19 = smov [#allocation20]   ;;  %s3249_s25 = smov [#allocation2]  }
  0x5d   :  { %s158_s5 = sshll.u32 %s3248_s19, 4  ;;  %s33_s3 = sshll.u32 %s3249_s25, 4  ;;  %s159_s5 = int_to_ptr.vmem [resolvable:$true] %s158_s5  ;;  %s34_s3 = int_to_ptr.vmem [resolvable:$true] %s33_s3 }
  0x5e   :  { %s3001_s1 = scalar_lea.hbm %s3810_s11, 16 }
  0x5f   :  { %p3002_p12 = scmp.ne.s32.totalorder %s3810_s11, %s3001_s1  ;;  %p3005_p13 = scmp.lt.u32.totalorder %s3001_s1, %s3810_s11 }
  0x61   :  { %p3007_p0 = pnand %p3005_p13, %p3002_p12 }
  0x63   :  { %3010 = shalt.err (!%p3007_p0)
}
  0x64   :  { %s3011_s9 = scalar_lea.vmem %s159_s5, 16  ;;  %s3015_s26 = scalar_lea.vmem %s159_s5, 32 }
  0x65   :  { %p3012_p1 = scmp.ne.s32.totalorder %s159_s5, %s3011_s9  ;;  %p3016_p2 = scmp.lt.s32.totalorder %s159_s5, %s159_s5 }
  0x66   :  { %p3017_p3 = scmp.lt.s32.totalorder %s3015_s26, %s3011_s9 }
  0x68   :  { %p3018_p4 = por %p3017_p3, %p3016_p2 }
  0x6a   :  { %p3019_p5 = pnand %p3018_p4, %p3012_p1 }
  0x6c   :  { %3022 = shalt.err (!%p3019_p5)
}
  0x6d   :  { %161 = dma.hbm_to_vmem [thread:$0]  %s3810_s11, 16, %s159_s5, [#allocation21]  }
  0x6e   :  { %s3023_s30 = scalar_lea.hbm %s3799_s0, 192 }
  0x6f   :  { %p3024_p6 = scmp.ne.s32.totalorder %s3799_s0, %s3023_s30  ;;  %p3027_p7 = scmp.lt.u32.totalorder %s3023_s30, %s3799_s0 }
  0x71   :  { %p3029_p8 = pnand %p3027_p7, %p3024_p6 }
  0x73   :  { %3032 = shalt.err (!%p3029_p8)
}
  0x74   :  { %s3033_s1 = scalar_lea.vmem %s34_s3, 192  ;;  %p3038_p10 = scmp.lt.s32.totalorder %s34_s3, %s34_s3 }
  0x75   :  { %p3034_p9 = scmp.ne.s32.totalorder %s34_s3, %s3033_s1  ;;  %p3039_p11 = scmp.lt.s32.totalorder %s3033_s1, %s3033_s1 }
  0x77   :  { %p3040_p12 = por %p3039_p11, %p3038_p10 }
  0x79   :  { %p3041_p13 = pnand %p3040_p12, %p3034_p9 }
  0x7b   :  { %3044 = shalt.err (!%p3041_p13)
}
  0x7c   :  { %s3250_s11 = smov 2   ;;  %s3251_s27 = smov [#allocation7]  }
  0x7d   :  { %39 = dma.hbm_to_vmem [thread:$0]  %s3799_s0, 192, %s34_s3, [#allocation3], %s3245_s28, %s3245_s28, %s3250_s11  }
  0x7e   :  { %s58_s29 = sshll.u32 %s3251_s27, 4  ;;  %s3252_s15 = smov [#allocation10]   ;;  %s59_s29 = int_to_ptr.vmem [resolvable:$true] %s58_s29 }
  0x7f   :  { %s80_s9 = sshll.u32 %s3252_s15, 4  ;;  %s3045_s17 = scalar_lea.hbm %s3801_s2, 32  ;;  %s81_s9 = int_to_ptr.vmem [resolvable:$true] %s80_s9 }
  0x80   :  { %p3046_p0 = scmp.ne.s32.totalorder %s3801_s2, %s3045_s17  ;;  %p3049_p1 = scmp.lt.u32.totalorder %s3045_s17, %s3801_s2 }
  0x82   :  { %p3051_p2 = pnand %p3049_p1, %p3046_p0 }
  0x84   :  { %3054 = shalt.err (!%p3051_p2)
}
  0x85   :  { %s3055_s0 = scalar_lea.vmem %s59_s29, 32  ;;  %p3060_p4 = scmp.lt.s32.totalorder %s59_s29, %s59_s29 }
  0x86   :  { %p3056_p3 = scmp.ne.s32.totalorder %s59_s29, %s3055_s0  ;;  %p3061_p5 = scmp.lt.s32.totalorder %s3055_s0, %s3055_s0 }
  0x88   :  { %p3062_p6 = por %p3061_p5, %p3060_p4 }
  0x8a   :  { %p3063_p7 = pnand %p3062_p6, %p3056_p3 }
  0x8c   :  { %3066 = shalt.err (!%p3063_p7)
}
  0x8d   :  { %61 = dma.hbm_to_vmem [thread:$0]  %s3801_s2, 32, %s59_s29, [#allocation6]  }
  0x8e   :  { %s3067_s21 = scalar_lea.hbm %s3803_s4, 16 }
  0x8f   :  { %p3068_p8 = scmp.ne.s32.totalorder %s3803_s4, %s3067_s21  ;;  %p3071_p9 = scmp.lt.u32.totalorder %s3067_s21, %s3803_s4 }
  0x91   :  { %p3073_p10 = pnand %p3071_p9, %p3068_p8 }
  0x93   :  { %3076 = shalt.err (!%p3073_p10)
}
  0x94   :  { %s3077_s27 = scalar_lea.vmem %s81_s9, 16  ;;  %s3081_s15 = scalar_lea.vmem %s81_s9, 32 }
  0x95   :  { %p3078_p11 = scmp.ne.s32.totalorder %s81_s9, %s3077_s27  ;;  %p3082_p12 = scmp.lt.s32.totalorder %s81_s9, %s81_s9 }
  0x96   :  { %p3083_p13 = scmp.lt.s32.totalorder %s3081_s15, %s3077_s27 }
  0x98   :  { %p3084_p0 = por %p3083_p13, %p3082_p12 }
  0x9a   :  { %p3085_p1 = pnand %p3084_p0, %p3078_p11 }
  0x9c   :  { %3088 = shalt.err (!%p3085_p1)
}
  0x9d   :  { %83 = dma.hbm_to_vmem [thread:$0]  %s3803_s4, 16, %s81_s9, [#allocation9]  }
  0x9e   :  { %s3253_s26 = smov [#allocation13]   ;;  %s3254_s17 = smov [#allocation16]  }
  0x9f   :  { %s101_s16 = sshll.u32 %s3253_s26, 4  ;;  %s123_s18 = sshll.u32 %s3254_s17, 4  ;;  %s102_s16 = int_to_ptr.vmem [resolvable:$true] %s101_s16  ;;  %s3456_s18 = int_to_ptr.vmem [resolvable:$true] %s123_s18 }
  0xa0   :  { %s3089_s19 = scalar_lea.hbm %s3805_s6, 2048 }
  0xa1   :  { %p3090_p2 = scmp.ne.s32.totalorder %s3805_s6, %s3089_s19  ;;  %p3093_p3 = scmp.lt.u32.totalorder %s3089_s19, %s3805_s6 }
  0xa3   :  { %p3095_p4 = pnand %p3093_p3, %p3090_p2 }
  0xa5   :  { %3098 = shalt.err (!%p3095_p4)
}
  0xa6   :  { %s3099_s4 = scalar_lea.vmem %s102_s16, 2048  ;;  %p3104_p6 = scmp.lt.s32.totalorder %s102_s16, %s102_s16 }
  0xa7   :  { %p3100_p5 = scmp.ne.s32.totalorder %s102_s16, %s3099_s4  ;;  %p3105_p7 = scmp.lt.s32.totalorder %s3099_s4, %s3099_s4 }
  0xa9   :  { %p3106_p8 = por %p3105_p7, %p3104_p6 }
  0xab   :  { %p3107_p9 = pnand %p3106_p8, %p3100_p5 }
  0xad   :  { %3110 = shalt.err (!%p3107_p9)
}
  0xae   :  { %107 = dma.hbm_to_vmem [thread:$0]  %s3805_s6, 2048, %s102_s16, [#allocation12], %s3240_s23, %s3240_s23, %s3241_s24  }
  0xaf   :  { %s3111_s11 = scalar_lea.hbm %s3807_s8, 2048 }
  0xb0   :  { %p3112_p10 = scmp.ne.s32.totalorder %s3807_s8, %s3111_s11  ;;  %p3115_p11 = scmp.lt.u32.totalorder %s3111_s11, %s3807_s8 }
  0xb2   :  { %p3117_p12 = pnand %p3115_p11, %p3112_p10 }
  0xb4   :  { %3120 = shalt.err (!%p3117_p12)
}
  0xb5   :  { %s3121_s2 = scalar_lea.vmem %s3456_s18, 2048  ;;  %p3126_p0 = scmp.lt.s32.totalorder %s3456_s18, %s3456_s18 }
  0xb6   :  { %p3122_p13 = scmp.ne.s32.totalorder %s3456_s18, %s3121_s2  ;;  %p3127_p1 = scmp.lt.s32.totalorder %s3121_s2, %s3121_s2 }
  0xb8   :  { %p3128_p2 = por %p3127_p1, %p3126_p0 }
  0xba   :  { %p3129_p3 = pnand %p3128_p2, %p3122_p13 }
  0xbc   :  { %3132 = shalt.err (!%p3129_p3)
}
  0xbd   :  { %129 = dma.hbm_to_vmem [thread:$0]  %s3807_s8, 2048, %s3456_s18, [#allocation15], %s3240_s23, %s3240_s23, %s3241_s24  }
  0xbe   :  { %s3255_s26 = smov [#allocation19]   ;;  %s3256_s17 = smov [#allocation22]  }
  0xbf   :  { %s145_s16 = sshll.u32 %s3255_s26, 4  ;;  %s167_s7 = sshll.u32 %s3256_s17, 4  ;;  %s146_s16 = int_to_ptr.vmem [resolvable:$true] %s145_s16  ;;  %s3493_s7 = int_to_ptr.vmem [resolvable:$true] %s167_s7 }
  0xc0   :  { %s3133_s0 = scalar_lea.hbm %s3809_s10, 2048 }
  0xc1   :  { %p3134_p4 = scmp.ne.s32.totalorder %s3809_s10, %s3133_s0  ;;  %p3137_p5 = scmp.lt.u32.totalorder %s3133_s0, %s3809_s10 }
  0xc3   :  { %p3139_p6 = pnand %p3137_p5, %p3134_p4 }
  0xc5   :  { %3142 = shalt.err (!%p3139_p6)
}
  0xc6   :  { %s3143_s8 = scalar_lea.vmem %s146_s16, 2048  ;;  %p3148_p8 = scmp.lt.s32.totalorder %s146_s16, %s146_s16 }
  0xc7   :  { %p3144_p7 = scmp.ne.s32.totalorder %s146_s16, %s3143_s8  ;;  %p3149_p9 = scmp.lt.s32.totalorder %s3143_s8, %s3143_s8 }
  0xc9   :  { %p3150_p10 = por %p3149_p9, %p3148_p8 }
  0xcb   :  { %p3151_p11 = pnand %p3150_p10, %p3144_p7 }
  0xcd   :  { %3154 = shalt.err (!%p3151_p11)
}
  0xce   :  { %151 = dma.hbm_to_vmem [thread:$0]  %s3809_s10, 2048, %s146_s16, [#allocation18], %s3240_s23, %s3240_s23, %s3241_s24  }
  0xcf   :  { %s3155_s1 = scalar_lea.hbm %s3811_s12, 2048 }
  0xd0   :  { %p3156_p12 = scmp.ne.s32.totalorder %s3811_s12, %s3155_s1  ;;  %p3159_p13 = scmp.lt.u32.totalorder %s3155_s1, %s3811_s12 }
  0xd2   :  { %p3161_p0 = pnand %p3159_p13, %p3156_p12 }
  0xd4   :  { %3164 = shalt.err (!%p3161_p0)
}
  0xd5   :  { %s3165_s15 = scalar_lea.vmem %s3493_s7, 2048  ;;  %p3170_p2 = scmp.lt.s32.totalorder %s3493_s7, %s3493_s7 }
  0xd6   :  { %p3166_p1 = scmp.ne.s32.totalorder %s3493_s7, %s3165_s15  ;;  %p3171_p3 = scmp.lt.s32.totalorder %s3165_s15, %s3165_s15 }
  0xd8   :  { %p3172_p4 = por %p3171_p3, %p3170_p2 }
  0xda   :  { %p3173_p5 = pnand %p3172_p4, %p3166_p1 }
  0xdc   :  { %3176 = shalt.err (!%p3173_p5)
}
  0xdd   :  { %173 = dma.hbm_to_vmem [thread:$0]  %s3811_s12, 2048, %s3493_s7, [#allocation21], %s3240_s23, %s3240_s23, %s3241_s24  }
  0xde   :  { %s3257_s6 = smov [#allocation23]   ;;  %s3177_s17 = scalar_lea.hbm %s3812_s13, 16 }
  0xdf   :  { %s180_s29 = sshll.u32 %s3257_s6, 4  ;;  %p3178_p6 = scmp.ne.s32.totalorder %s3812_s13, %s3177_s17  ;;  %s181_s29 = int_to_ptr.vmem [resolvable:$true] %s180_s29 }
  0xe0   :  { %p3181_p7 = scmp.lt.u32.totalorder %s3177_s17, %s3812_s13 }
  0xe2   :  { %p3183_p8 = pnand %p3181_p7, %p3178_p6 }
  0xe4   :  { %3186 = shalt.err (!%p3183_p8)
}
  0xe5   :  { %s3187_s3 = scalar_lea.vmem %s181_s29, 16  ;;  %s3191_s12 = scalar_lea.vmem %s181_s29, 32 }
  0xe6   :  { %p3188_p9 = scmp.ne.s32.totalorder %s181_s29, %s3187_s3  ;;  %p3192_p10 = scmp.lt.s32.totalorder %s181_s29, %s181_s29 }
  0xe7   :  { %p3193_p11 = scmp.lt.s32.totalorder %s3191_s12, %s3187_s3 }
  0xe9   :  { %p3194_p12 = por %p3193_p11, %p3192_p10 }
  0xeb   :  { %p3195_p13 = pnand %p3194_p12, %p3188_p9 }
  0xed   :  { %3198 = shalt.err (!%p3195_p13)
}
  0xee   :  { %183 = dma.hbm_to_vmem [thread:$0]  %s3812_s13, 16, %s181_s29, [#allocation24]  }
  0xef   :  { %3221 = dma.done.wait [#allocation3], 192  }
  0xf0   :  { %3222 = vsyncadd [#allocation3], 4294967104 }
  0xf1   :  { %3223 = dma.done.wait [#allocation6], 288  }
  0xf2   :  { %3224 = vsyncadd [#allocation6], 4294967008 }
  0xf3   :  { %3225 = dma.done.wait [#allocation9], 2064  }
  0xf4   :  { %3226 = vsyncadd [#allocation9], 4294965232 }
  0xf5   :  { %3227 = dma.done.wait [#allocation12], 10240  }
  0xf6   :  { %3228 = vsyncadd [#allocation12], 4294957056 }
  0xf7   :  { %3229 = dma.done.wait [#allocation15], 2064  }
  0xf8   :  { %3230 = vsyncadd [#allocation15], 4294965232 }
  0xf9   :  { %3231 = dma.done.wait [#allocation18], 2064  }
  0xfa   :  { %3232 = vsyncadd [#allocation18], 4294965232 }
  0xfb   :  { %3233 = dma.done.wait [#allocation21], 2064  }
  0xfc   :  { %3234 = vsyncadd [#allocation21], 4294965232 }
  0xfd   :  { %3235 = dma.done.wait [#allocation24], 16  }
  0xfe   :  { %3236 = vsyncadd [#allocation24], 4294967280  ;;  %v3258_v0 = vmov 0.0|0.0   ;;  %vm3259_vm0 = vmmov 0   ;;  %v3260_v1 = vmov 0.0   ;;  %v226_v2 = vld [vmem:[#allocation8] sm:$0xff] }
  0xff   :  { %2401 = vmatprep.subr.bf16.mxu0 %v3258_v0  ;;  %2425 = vmatprep.subr.bf16.mxu1 %v3258_v0  ;;  %v227_v3 = vld [vmem:[#allocation8 + $0x8] sm:$0xff]  ;;  %v228_v4 = vld [vmem:[#allocation8 + $0x10] sm:$0xff]  ;;  %v229_v6 = vld [vmem:[#allocation8 + $0x18] sm:$0xff]  ;;  %s3263_s13 = smov [#allocation25]  }
 0x100   :  { %2080 = vmatprep.mubr.msk.f32.mxu0 %vm3259_vm0, %v3260_v1  ;;  %2115 = vmatprep.mubr.msk.f32.mxu1 %vm3259_vm0, %v3260_v1  ;;  %v3548_v5 = vpack.c.bf16 %v227_v3, %v226_v2  ;;  %v3551_v7 = vpack.c.bf16 %v229_v6, %v228_v4  ;;  %v230_v8 = vld [vmem:[#allocation8 + $0x20] sm:$0xff]  ;;  %v231_v9 = vld [vmem:[#allocation8 + $0x28] sm:$0xff]  ;;  %v232_v11 = vld [vmem:[#allocation8 + $0x30] sm:$0xff]  ;;  %s1847_s4 = sshll.u32 %s3263_s13, 4  ;;  %s1848_s4 = int_to_ptr.vmem [resolvable:$true] %s1847_s4 }
 0x101   :  { %v3557_v10 = vpack.c.bf16 %v231_v9, %v230_v8  ;;  %v233_v12 = vld [vmem:[#allocation8 + $0x38] sm:$0xff]  ;;  %v234_v14 = vld [vmem:[#allocation8 + $0x40] sm:$0xff]  ;;  %v235_v15 = vld [vmem:[#allocation8 + $0x48] sm:$0xff]  ;;  %s3199_s8 = scalar_lea.vmem %s1848_s4, 256  ;;  %p3204_p1 = scmp.lt.s32.totalorder %s1848_s4, %s1848_s4 }
 0x102   :  { %2403 = vmatpush3.bf16.msra.mxu0 %v3548_v5  ;;  %2427 = vmatpush3.bf16.msra.mxu1 %v3548_v5  ;;  %v3563_v13 = vpack.c.bf16 %v233_v12, %v232_v11  ;;  %v3569_v16 = vpack.c.bf16 %v235_v15, %v234_v14  ;;  %v236_v17 = vld [vmem:[#allocation8 + $0x50] sm:$0xff]  ;;  %v237_v18 = vld [vmem:[#allocation8 + $0x58] sm:$0xff]  ;;  %v238_v20 = vld [vmem:[#allocation8 + $0x60] sm:$0xff]  ;;  %p3200_p0 = scmp.ne.s32.totalorder %s1848_s4, %s3199_s8  ;;  %p3205_p2 = scmp.lt.s32.totalorder %s3199_s8, %s3199_s8 }
 0x103   :  { %2404 = vmatprep.subr.bf16.mxu0 %v3258_v0  ;;  %2428 = vmatprep.subr.bf16.mxu1 %v3258_v0  ;;  %v3575_v19 = vpack.c.bf16 %v237_v18, %v236_v17  ;;  %v239_v21 = vld [vmem:[#allocation8 + $0x68] sm:$0xff]  ;;  %v240_v23 = vld [vmem:[#allocation8 + $0x70] sm:$0xff]  ;;  %v241_v24 = vld [vmem:[#allocation8 + $0x78] sm:$0xff] }
 0x104   :  { %v3581_v22 = vpack.c.bf16 %v239_v21, %v238_v20  ;;  %v3587_v25 = vpack.c.bf16 %v241_v24, %v240_v23  ;;  %v307_v26 = vld [vmem:[#allocation2] sm:$0x3]  ;;  %v385_v27 = vld [vmem:[#allocation2 + $0x2] sm:$0x3]  ;;  %v457_v28 = vld [vmem:[#allocation2 + $0x4] sm:$0x3]  ;;  %p3206_p3 = por %p3205_p2, %p3204_p1 }
 0x105   :  { %v529_v29 = vld [vmem:[#allocation2 + $0x6] sm:$0x3]  ;;  %v246_v30 = vld [vmem:[#allocation11 + $0x18] sm:$0xff]  ;;  %v245_v33 = vld [vmem:[#allocation11 + $0x10] sm:$0xff] }
 0x106   :  { %2406 = vmatpush3.bf16.msra.mxu0 %v3551_v7  ;;  %2430 = vmatpush3.bf16.msra.mxu1 %v3551_v7  ;;  %v250_v31 = vld [vmem:[#allocation11 + $0x38] sm:$0xff]  ;;  %v249_v34 = vld [vmem:[#allocation11 + $0x30] sm:$0xff]  ;;  %v601_v37 = vld [vmem:[#allocation2 + $0x8] sm:$0x3]  ;;  %p3207_p4 = pnand %p3206_p3, %p3200_p0 }
 0x107   :  { %2407 = vmatprep.subr.bf16.mxu0 %v3258_v0  ;;  %2431 = vmatprep.subr.bf16.mxu1 %v3258_v0  ;;  %v2545_v32 = vpack.c.bf16 %v250_v31, %v246_v30  ;;  %v254_v35 = vld [vmem:[#allocation11 + $0x58] sm:$0xff]  ;;  %v673_v38 = vld [vmem:[#allocation2 + $0xa] sm:$0x3]  ;;  %v2547_v39 = vpack.c.bf16 %v249_v34, %v245_v33  ;;  %v253_v41 = vld [vmem:[#allocation11 + $0x50] sm:$0xff] }
 0x108   :  { %v258_v36 = vld [vmem:[#allocation11 + $0x78] sm:$0xff]  ;;  %v257_v42 = vld [vmem:[#allocation11 + $0x70] sm:$0xff]  ;;  %v248_v17 = vld [vmem:[#allocation11 + $0x28] sm:$0xff] }
 0x109   :  { %v2549_v40 = vpack.c.bf16 %v258_v36, %v254_v35  ;;  %v262_v43 = vld [vmem:[#allocation11 + $0x98] sm:$0xff]  ;;  %v2551_v45 = vpack.c.bf16 %v257_v42, %v253_v41  ;;  %v261_v47 = vld [vmem:[#allocation11 + $0x90] sm:$0xff]  ;;  %v243_v20 = vld [vmem:[#allocation11] sm:$0xff] }
 0x10a   :  { %2409 = vmatpush3.bf16.msra.mxu0 %v3557_v10  ;;  %2433 = vmatpush3.bf16.msra.mxu1 %v3557_v10  ;;  %v266_v44 = vld [vmem:[#allocation11 + $0xb8] sm:$0xff]  ;;  %v265_v48 = vld [vmem:[#allocation11 + $0xb0] sm:$0xff]  ;;  %v247_v21 = vld [vmem:[#allocation11 + $0x20] sm:$0xff] }
 0x10b   :  { %2410 = vmatprep.subr.bf16.mxu0 %v3258_v0  ;;  %2434 = vmatprep.subr.bf16.mxu1 %v3258_v0  ;;  %v2553_v46 = vpack.c.bf16 %v266_v44, %v262_v43  ;;  %v270_v49 = vld [vmem:[#allocation11 + $0xd8] sm:$0xff]  ;;  %v2555_v51 = vpack.c.bf16 %v265_v48, %v261_v47  ;;  %v269_v53 = vld [vmem:[#allocation11 + $0xd0] sm:$0xff]  ;;  %v252_v23 = vld [vmem:[#allocation11 + $0x48] sm:$0xff] }
 0x10c   :  { %v274_v50 = vld [vmem:[#allocation11 + $0xf8] sm:$0xff]  ;;  %v273_v54 = vld [vmem:[#allocation11 + $0xf0] sm:$0xff]  ;;  %v256_v24 = vld [vmem:[#allocation11 + $0x68] sm:$0xff] }
 0x10d   :  { %v2557_v52 = vpack.c.bf16 %v274_v50, %v270_v49  ;;  %v278_v55 = vld [vmem:[#allocation11 + $0x118] sm:$0xff]  ;;  %v2559_v57 = vpack.c.bf16 %v273_v54, %v269_v53  ;;  %v277_v59 = vld [vmem:[#allocation11 + $0x110] sm:$0xff]  ;;  %v3677_v30 = vpack.c.bf16 %v256_v24, %v252_v23  ;;  %v251_v31 = vld [vmem:[#allocation11 + $0x40] sm:$0xff] }
 0x10e   :  { %2412 = vmatpush3.bf16.msra.mxu0 %v3563_v13  ;;  %2436 = vmatpush3.bf16.msra.mxu1 %v3563_v13  ;;  %v282_v56 = vld [vmem:[#allocation11 + $0x138] sm:$0xff]  ;;  %v281_v60 = vld [vmem:[#allocation11 + $0x130] sm:$0xff]  ;;  %v260_v35 = vld [vmem:[#allocation11 + $0x88] sm:$0xff] }
 0x10f   :  { %2413 = vmatprep.subr.bf16.mxu0 %v3258_v0  ;;  %2437 = vmatprep.subr.bf16.mxu1 %v3258_v0  ;;  %v2561_v58 = vpack.c.bf16 %v282_v56, %v278_v55  ;;  %v286_v61 = vld [vmem:[#allocation11 + $0x158] sm:$0xff]  ;;  %v2563_v63 = vpack.c.bf16 %v281_v60, %v277_v59  ;;  %v285_v2 = vld [vmem:[#allocation11 + $0x150] sm:$0xff]  ;;  %v264_v36 = vld [vmem:[#allocation11 + $0xa8] sm:$0xff] }
 0x110   :  { %v290_v62 = vld [vmem:[#allocation11 + $0x178] sm:$0xff]  ;;  %v289_v3 = vld [vmem:[#allocation11 + $0x170] sm:$0xff]  ;;  %v268_v41 = vld [vmem:[#allocation11 + $0xc8] sm:$0xff] }
 0x111   :  { %v294_v4 = vld [vmem:[#allocation11 + $0x198] sm:$0xff]  ;;  %v2567_v6 = vpack.c.bf16 %v289_v3, %v285_v2  ;;  %v293_v8 = vld [vmem:[#allocation11 + $0x190] sm:$0xff]  ;;  %v272_v42 = vld [vmem:[#allocation11 + $0xe8] sm:$0xff] }
 0x112   :  { %2415 = vmatpush3.bf16.msra.mxu0 %v3569_v16  ;;  %2439 = vmatpush3.bf16.msra.mxu1 %v3569_v16  ;;  %v297_v9 = vld [vmem:[#allocation11 + $0x1b0] sm:$0xff]  ;;  %v306_v11 = vld [vmem:[#allocation11 + $0x1f8] sm:$0xff]  ;;  %v3695_v44 = vpack.c.bf16 %v272_v42, %v268_v41  ;;  %v276_v47 = vld [vmem:[#allocation11 + $0x108] sm:$0xff] }
 0x113   :  { %2416 = vmatprep.subr.bf16.mxu0 %v3258_v0  ;;  %2440 = vmatprep.subr.bf16.mxu1 %v3258_v0  ;;  %v2571_v12 = vpack.c.bf16 %v297_v9, %v293_v8  ;;  %v301_v14 = vld [vmem:[#allocation11 + $0x1d0] sm:$0xff]  ;;  %v280_v48 = vld [vmem:[#allocation11 + $0x128] sm:$0xff] }
 0x114   :  { %v305_v15 = vld [vmem:[#allocation11 + $0x1f0] sm:$0xff]  ;;  %v3703_v50 = vpack.c.bf16 %v280_v48, %v276_v47  ;;  %v284_v53 = vld [vmem:[#allocation11 + $0x148] sm:$0xff] }
 0x115   :  { %v2575_v18 = vpack.c.bf16 %v305_v15, %v301_v14  ;;  %v288_v54 = vld [vmem:[#allocation11 + $0x168] sm:$0xff]  ;;  %v1214_v42 = vld [vmem:[#allocation13 + $0x70] sm:$0xff] }
 0x116   :  { %2418 = vmatpush3.bf16.msra.mxu0 %v3575_v19  ;;  %2442 = vmatpush3.bf16.msra.mxu1 %v3575_v19  ;;  %v2629_v56 = vpack.c.bf16 %v288_v54, %v284_v53  ;;  %v292_v59 = vld [vmem:[#allocation11 + $0x188] sm:$0xff] }
 0x117   :  { %2419 = vmatprep.subr.bf16.mxu0 %v3258_v0  ;;  %2443 = vmatprep.subr.bf16.mxu1 %v3258_v0  ;;  %v296_v60 = vld [vmem:[#allocation11 + $0x1a8] sm:$0xff] }
 0x118   :  { %v300_v2 = vld [vmem:[#allocation11 + $0x1c8] sm:$0xff] }
 0x119   :  { %v304_v3 = vld [vmem:[#allocation11 + $0x1e8] sm:$0xff] }
 0x11a   :  { %2421 = vmatpush3.bf16.msra.mxu0 %v3581_v22  ;;  %2445 = vmatpush3.bf16.msra.mxu1 %v3581_v22  ;;  %v1201_v15 = vld [vmem:[#allocation13 + $0x8] sm:$0xff] }
 0x11b   :  { %2422 = vmatprep.subr.bf16.mxu0 %v3258_v0  ;;  %2446 = vmatprep.subr.bf16.mxu1 %v3258_v0  ;;  %v1217_v47 = vld [vmem:[#allocation16 + $0x8] sm:$0xff] }
 0x11c   :  { %v1221_v53 = vld [vmem:[#allocation16 + $0x28] sm:$0xff] }
 0x11e   :  { %2424 = vmatpush3.bf16.msra.mxu0 %v3587_v25  ;;  %2448 = vmatpush3.bf16.msra.mxu1 %v3587_v25 }
 0x11f   :  { %2449 = vmatprep.subr.bf16.mxu0 %v3258_v0  ;;  %2473 = vmatprep.subr.bf16.mxu1 %v3258_v0 }
 0x121   :  { %2081 = vmatmul.mubr.f32.vlgmr.msra.gmra.mrb[0].mxu0 %v307_v26  ;;  %2116 = vmatmul.mubr.f32.vlgmr.msra.gmra.mrb[0].mxu1 %v385_v27  ;;  %v3674_v26 = vpack.c.bf16 %v247_v21, %v243_v20 }
 0x122   :  { %2451 = vmatpush3.bf16.msra.mxu0 %v3548_v5  ;;  %2475 = vmatpush3.bf16.msra.mxu1 %v3548_v5 }
 0x123   :  { %2452 = vmatprep.subr.bf16.mxu0 %v3258_v0  ;;  %2476 = vmatprep.subr.bf16.mxu1 %v3258_v0 }
 0x124   :  { %2150 = vmatprep.mubr.msk.f32.mxu0 %vm3259_vm0, %v3260_v1  ;;  %2185 = vmatprep.mubr.msk.f32.mxu1 %vm3259_vm0, %v3260_v1 }
 0x126   :  { %2454 = vmatpush3.bf16.msra.mxu0 %v3551_v7  ;;  %2478 = vmatpush3.bf16.msra.mxu1 %v3551_v7 }
 0x127   :  { %2455 = vmatprep.subr.bf16.mxu0 %v3258_v0  ;;  %2479 = vmatprep.subr.bf16.mxu1 %v3258_v0 }
 0x12a   :  { %2457 = vmatpush3.bf16.msra.mxu0 %v3557_v10  ;;  %2481 = vmatpush3.bf16.msra.mxu1 %v3557_v10 }
 0x12b   :  { %2458 = vmatprep.subr.bf16.mxu0 %v3258_v0  ;;  %2482 = vmatprep.subr.bf16.mxu1 %v3258_v0 }
 0x12e   :  { %2460 = vmatpush3.bf16.msra.mxu0 %v3563_v13  ;;  %2484 = vmatpush3.bf16.msra.mxu1 %v3563_v13 }
 0x12f   :  { %2461 = vmatprep.subr.bf16.mxu0 %v3258_v0  ;;  %2485 = vmatprep.subr.bf16.mxu1 %v3258_v0 }
 0x132   :  { %2463 = vmatpush3.bf16.msra.mxu0 %v3569_v16  ;;  %2487 = vmatpush3.bf16.msra.mxu1 %v3569_v16 }
 0x133   :  { %2464 = vmatprep.subr.bf16.mxu0 %v3258_v0  ;;  %2488 = vmatprep.subr.bf16.mxu1 %v3258_v0 }
 0x136   :  { %2466 = vmatpush3.bf16.msra.mxu0 %v3575_v19  ;;  %2490 = vmatpush3.bf16.msra.mxu1 %v3575_v19 }
 0x137   :  { %2467 = vmatprep.subr.bf16.mxu0 %v3258_v0  ;;  %2491 = vmatprep.subr.bf16.mxu1 %v3258_v0 }
 0x13a   :  { %2469 = vmatpush3.bf16.msra.mxu0 %v3581_v22  ;;  %2493 = vmatpush3.bf16.msra.mxu1 %v3581_v22 }
 0x13b   :  { %2470 = vmatprep.subr.bf16.mxu0 %v3258_v0  ;;  %2494 = vmatprep.subr.bf16.mxu1 %v3258_v0 }
 0x13e   :  { %2472 = vmatpush3.bf16.msra.mxu0 %v3587_v25  ;;  %2496 = vmatpush3.bf16.msra.mxu1 %v3587_v25 }
 0x13f   :  { %2497 = vmatprep.subr.bf16.mxu0 %v3258_v0  ;;  %2521 = vmatprep.subr.bf16.mxu1 %v3258_v0 }
 0x141   :  { %2151 = vmatmul.mubr.f32.vlgmr.msra.gmra.mrb[2].mxu0 %v457_v28  ;;  %2186 = vmatmul.mubr.f32.vlgmr.msra.gmra.mrb[2].mxu1 %v529_v29 }
 0x142   :  { %2499 = vmatpush3.bf16.msra.mxu0 %v3548_v5  ;;  %2523 = vmatpush3.bf16.msra.mxu1 %v3548_v5  ;;  %v298_v5 = vld [vmem:[#allocation11 + $0x1b8] sm:$0xff] }
 0x143   :  { %2500 = vmatprep.subr.bf16.mxu0 %v3258_v0  ;;  %2524 = vmatprep.subr.bf16.mxu1 %v3258_v0 }
 0x144   :  { %2220 = vmatprep.mubr.msk.f32.mxu0 %vm3259_vm0, %v3260_v1  ;;  %2255 = vmatprep.mubr.msk.f32.mxu1 %vm3259_vm0, %v3260_v1 }
 0x146   :  { %2502 = vmatpush3.bf16.msra.mxu0 %v3551_v7  ;;  %2526 = vmatpush3.bf16.msra.mxu1 %v3551_v7  ;;  %v2569_v7 = vpack.c.bf16 %v298_v5, %v294_v4  ;;  %v2637_v5 = vpack.c.bf16 %v304_v3, %v300_v2  ;;  %v1229_v2 = vld [vmem:[#allocation16 + $0x68] sm:$0xff] }
 0x147   :  { %2503 = vmatprep.subr.bf16.mxu0 %v3258_v0  ;;  %2527 = vmatprep.subr.bf16.mxu1 %v3258_v0 }
 0x14a   :  { %2505 = vmatpush3.bf16.msra.mxu0 %v3557_v10  ;;  %2529 = vmatpush3.bf16.msra.mxu1 %v3557_v10  ;;  %v302_v10 = vld [vmem:[#allocation11 + $0x1d8] sm:$0xff] }
 0x14b   :  { %2506 = vmatprep.subr.bf16.mxu0 %v3258_v0  ;;  %2530 = vmatprep.subr.bf16.mxu1 %v3258_v0 }
 0x14e   :  { %2508 = vmatpush3.bf16.msra.mxu0 %v3563_v13  ;;  %2532 = vmatpush3.bf16.msra.mxu1 %v3563_v13  ;;  %v2573_v13 = vpack.c.bf16 %v306_v11, %v302_v10 }
 0x14f   :  { %2509 = vmatprep.subr.bf16.mxu0 %v3258_v0  ;;  %2533 = vmatprep.subr.bf16.mxu1 %v3258_v0 }
 0x152   :  { %2511 = vmatpush3.bf16.msra.mxu0 %v3569_v16  ;;  %2535 = vmatpush3.bf16.msra.mxu1 %v3569_v16  ;;  %v244_v16 = vld [vmem:[#allocation11 + $0x8] sm:$0xff] }
 0x153   :  { %2512 = vmatprep.subr.bf16.mxu0 %v3258_v0  ;;  %2536 = vmatprep.subr.bf16.mxu1 %v3258_v0 }
 0x156   :  { %2514 = vmatpush3.bf16.msra.mxu0 %v3575_v19  ;;  %2538 = vmatpush3.bf16.msra.mxu1 %v3575_v19  ;;  %v3668_v19 = vpack.c.bf16 %v248_v17, %v244_v16  ;;  %v1202_v17 = vld [vmem:[#allocation13 + $0x10] sm:$0xff] }
 0x157   :  { %2515 = vmatprep.subr.bf16.mxu0 %v3258_v0  ;;  %2539 = vmatprep.subr.bf16.mxu1 %v3258_v0 }
 0x15a   :  { %2517 = vmatpush3.bf16.msra.mxu0 %v3581_v22  ;;  %2541 = vmatpush3.bf16.msra.mxu1 %v3581_v22  ;;  %v3672_v22 = vld [vmem:[#allocation10] ss:$0 sm:$0xff] }
 0x15b   :  { %2518 = vmatprep.subr.bf16.mxu0 %v3258_v0  ;;  %2542 = vmatprep.subr.bf16.mxu1 %v3258_v0  ;;  %v2565_v0 = vpack.c.bf16 %v290_v62, %v286_v61  ;;  %v2633_v62 = vpack.c.bf16 %v296_v60, %v292_v59  ;;  %v1225_v59 = vld [vmem:[#allocation16 + $0x48] sm:$0xff] }
 0x15e   :  { %2520 = vmatpush3.bf16.msra.mxu0 %v3587_v25  ;;  %2544 = vmatpush3.bf16.msra.mxu1 %v3587_v25 }
 0x15f   :  { %2546 = vmatprep.subr.bf16.mxu0 %v2545_v32  ;;  %2578 = vmatprep.subr.bf16.mxu1 %v2545_v32  ;;  %v255_v32 = vld [vmem:[#allocation11 + $0x60] sm:$0xff] }
 0x161   :  { %2221 = vmatmul.mubr.f32.vlgmr.msra.gmra.mrb[4].mxu0 %v601_v37  ;;  %2256 = vmatmul.mubr.f32.vlgmr.msra.gmra.mrb[4].mxu1 %v673_v38  ;;  %v3681_v37 = vpack.c.bf16 %v255_v32, %v251_v31  ;;  %v3685_v38 = vpack.c.bf16 %v264_v36, %v260_v35  ;;  %v1206_v31 = vld [vmem:[#allocation13 + $0x30] sm:$0xff]  ;;  %v1207_v32 = vld [vmem:[#allocation13 + $0x38] sm:$0xff]  ;;  %v1209_v35 = vld [vmem:[#allocation13 + $0x48] sm:$0xff] }
 0x162   :  { %2548 = vmatpush1.bf16.msra.mxu0 %v2547_v39  ;;  %2580 = vmatpush1.bf16.msra.mxu1 %v2547_v39  ;;  %v259_v39 = vld [vmem:[#allocation11 + $0x80] sm:$0xff]  ;;  %v1210_v36 = vld [vmem:[#allocation13 + $0x50] sm:$0xff] }
 0x163   :  { %2550 = vmatprep.subr.bf16.mxu0 %v2549_v40  ;;  %2582 = vmatprep.subr.bf16.mxu1 %v2549_v40  ;;  %v263_v40 = vld [vmem:[#allocation11 + $0xa0] sm:$0xff] }
 0x164   :  { %808 = vmatprep.mubr.f32.mxu0 %v3260_v1  ;;  %878 = vmatprep.mubr.f32.mxu1 %v3260_v1  ;;  %v3691_v43 = vpack.c.bf16 %v263_v40, %v259_v39  ;;  %v1212_v39 = vld [vmem:[#allocation13 + $0x60] sm:$0xff]  ;;  %v1213_v40 = vld [vmem:[#allocation13 + $0x68] sm:$0xff] }
 0x165   :  { %v2761_v41 = vpack.c.bf16 %v1213_v40, %v1212_v39 }
 0x166   :  { %2552 = vmatpush1.bf16.msra.mxu0 %v2551_v45  ;;  %2584 = vmatpush1.bf16.msra.mxu1 %v2551_v45  ;;  %v267_v45 = vld [vmem:[#allocation11 + $0xc0] sm:$0xff] }
 0x167   :  { %2554 = vmatprep.subr.bf16.mxu0 %v2553_v46  ;;  %2586 = vmatprep.subr.bf16.mxu1 %v2553_v46  ;;  %v271_v46 = vld [vmem:[#allocation11 + $0xe0] sm:$0xff] }
 0x168   :  { %v3699_v49 = vpack.c.bf16 %v271_v46, %v267_v45  ;;  %v1199_v45 = vld [vmem:[#allocation5 + $0x8] sm:$0xff]  ;;  %v1216_v46 = vld [vmem:[#allocation16] sm:$0xff] }
 0x169   :  { %v2769_v48 = vpack.c.bf16 %v1217_v47, %v1216_v46  ;;  %v1867_v47 = vld [vmem:[#allocation14] ss:$0 sm:$0xff] }
 0x16a   :  { %2556 = vmatpush1.bf16.msra.mxu0 %v2555_v51  ;;  %2588 = vmatpush1.bf16.msra.mxu1 %v2555_v51  ;;  %v275_v51 = vld [vmem:[#allocation11 + $0x100] sm:$0xff] }
 0x16b   :  { %2558 = vmatprep.subr.bf16.mxu0 %v2557_v52  ;;  %2590 = vmatprep.subr.bf16.mxu1 %v2557_v52  ;;  %v279_v52 = vld [vmem:[#allocation11 + $0x120] sm:$0xff] }
 0x16c   :  { %v2627_v55 = vpack.c.bf16 %v279_v52, %v275_v51  ;;  %v1220_v51 = vld [vmem:[#allocation16 + $0x20] sm:$0xff] }
 0x16d   :  { %v2777_v54 = vpack.c.bf16 %v1221_v53, %v1220_v51 }
 0x16e   :  { %2560 = vmatpush1.bf16.msra.mxu0 %v2559_v57  ;;  %2592 = vmatpush1.bf16.msra.mxu1 %v2559_v57  ;;  %v283_v57 = vld [vmem:[#allocation11 + $0x140] sm:$0xff] }
 0x16f   :  { %2562 = vmatprep.subr.bf16.mxu0 %v2561_v58  ;;  %2594 = vmatprep.subr.bf16.mxu1 %v2561_v58  ;;  %v287_v58 = vld [vmem:[#allocation11 + $0x160] sm:$0xff] }
 0x170   :  { %v2631_v61 = vpack.c.bf16 %v287_v58, %v283_v57  ;;  %v1224_v58 = vld [vmem:[#allocation16 + $0x40] sm:$0xff] }
 0x171   :  { %v2785_v60 = vpack.c.bf16 %v1225_v59, %v1224_v58 }
 0x172   :  { %2564 = vmatpush1.bf16.msra.mxu0 %v2563_v63  ;;  %2596 = vmatpush1.bf16.msra.mxu1 %v2563_v63  ;;  %v291_v63 = vld [vmem:[#allocation11 + $0x180] sm:$0xff] }
 0x173   :  { %2566 = vmatprep.subr.bf16.mxu0 %v2565_v0  ;;  %2598 = vmatprep.subr.bf16.mxu1 %v2565_v0  ;;  %v295_v0 = vld [vmem:[#allocation11 + $0x1a0] sm:$0xff] }
 0x174   :  { %v2635_v4 = vpack.c.bf16 %v295_v0, %v291_v63  ;;  %v1228_v0 = vld [vmem:[#allocation16 + $0x60] sm:$0xff] }
 0x175   :  { %v2793_v3 = vpack.c.bf16 %v1229_v2, %v1228_v0 }
 0x176   :  { %2568 = vmatpush1.bf16.msra.mxu0 %v2567_v6  ;;  %2600 = vmatpush1.bf16.msra.mxu1 %v2567_v6  ;;  %v299_v6 = vld [vmem:[#allocation11 + $0x1c0] sm:$0xff] }
 0x177   :  { %2570 = vmatprep.subr.bf16.mxu0 %v2569_v7  ;;  %2602 = vmatprep.subr.bf16.mxu1 %v2569_v7  ;;  %v303_v7 = vld [vmem:[#allocation11 + $0x1e0] sm:$0xff] }
 0x178   :  { %v2639_v8 = vpack.c.bf16 %v303_v7, %v299_v6  ;;  %v3261_v7 = vmov 1966171168  }
 0x17a   :  { %2572 = vmatpush1.bf16.msra.mxu0 %v2571_v12  ;;  %2604 = vmatpush1.bf16.msra.mxu1 %v2571_v12 }
 0x17b   :  { %2574 = vmatprep.subr.bf16.mxu0 %v2573_v13  ;;  %2606 = vmatprep.subr.bf16.mxu1 %v2573_v13 }
 0x17e   :  { %2576 = vmatpush1.bf16.msra.mxu0 %v2575_v18  ;;  %2608 = vmatpush1.bf16.msra.mxu1 %v2575_v18  ;;  %v1203_v18 = vld [vmem:[#allocation13 + $0x18] sm:$0xff] }
 0x17f   :  { %2610 = vmatprep.subr.bf16.mxu0 %v3668_v19  ;;  %2642 = vmatprep.subr.bf16.mxu1 %v3668_v19  ;;  %v2741_v24 = vpack.c.bf16 %v1203_v18, %v1202_v17  ;;  %v1233_v18 = vld [vmem:[#allocation19 + $0x8] sm:$0xff] }
 0x1f4   :  { %v380_v25 = vpop.f32.mrb[0].mxu0  ;;  %v452_v27 = vpop.f32.mrb[0].mxu1 }
 0x1f5   :  { %v381_v28 = vadd.f32 %v3672_v22, %v380_v25  ;;  %v2082_v29 = vpop.f32.mrb[1].mxu0  ;;  %v453_v33 = vadd.f32 %v3672_v22, %v452_v27  ;;  %v2117_v34 = vpop.f32.mrb[1].mxu1  ;;  %v1198_v27 = vld [vmem:[#allocation5] sm:$0xff] }
 0x1f6   :  { %v1205_v29 = vld [vmem:[#allocation13 + $0x28] sm:$0xff]  ;;  %v1208_v34 = vld [vmem:[#allocation13 + $0x40] sm:$0xff] }
 0x1f7   :  { %809 = vmatmul.mubr.f32.vlgmr.msra.gmra.mrb[6].mxu0 %v381_v28  ;;  %879 = vmatmul.mubr.f32.vlgmr.msra.gmra.mrb[6].mxu1 %v453_v33  ;;  %v1204_v28 = vld [vmem:[#allocation13 + $0x20] sm:$0xff]  ;;  %v2749_v33 = vpack.c.bf16 %v1207_v32, %v1206_v31 }
 0x1f8   :  { %2612 = vmatpush1.bf16.msra.mxu0 %v3674_v26  ;;  %2644 = vmatpush1.bf16.msra.mxu1 %v3674_v26  ;;  %v1239_v31 = vld [vmem:[#allocation19 + $0x38] sm:$0xff] }
 0x1f9   :  { %2614 = vmatprep.subr.bf16.mxu0 %v3677_v30  ;;  %2646 = vmatprep.subr.bf16.mxu1 %v3677_v30 }
 0x1fa   :  { %948 = vmatprep.mubr.f32.mxu0 %v3260_v1  ;;  %1018 = vmatprep.mubr.f32.mxu1 %v3260_v1 }
 0x1fc   :  { %2616 = vmatpush1.bf16.msra.mxu0 %v3681_v37  ;;  %2648 = vmatpush1.bf16.msra.mxu1 %v3681_v37 }
 0x1fd   :  { %2618 = vmatprep.subr.bf16.mxu0 %v3685_v38  ;;  %2650 = vmatprep.subr.bf16.mxu1 %v3685_v38 }
 0x200   :  { %2620 = vmatpush1.bf16.msra.mxu0 %v3691_v43  ;;  %2652 = vmatpush1.bf16.msra.mxu1 %v3691_v43 }
 0x201   :  { %2622 = vmatprep.subr.bf16.mxu0 %v3695_v44  ;;  %2654 = vmatprep.subr.bf16.mxu1 %v3695_v44 }
 0x204   :  { %2624 = vmatpush1.bf16.msra.mxu0 %v3699_v49  ;;  %2656 = vmatpush1.bf16.msra.mxu1 %v3699_v49 }
 0x205   :  { %2626 = vmatprep.subr.bf16.mxu0 %v3703_v50  ;;  %2658 = vmatprep.subr.bf16.mxu1 %v3703_v50 }
 0x208   :  { %2628 = vmatpush1.bf16.msra.mxu0 %v2627_v55  ;;  %2660 = vmatpush1.bf16.msra.mxu1 %v2627_v55 }
 0x209   :  { %2630 = vmatprep.subr.bf16.mxu0 %v2629_v56  ;;  %2662 = vmatprep.subr.bf16.mxu1 %v2629_v56 }
 0x20c   :  { %2632 = vmatpush1.bf16.msra.mxu0 %v2631_v61  ;;  %2664 = vmatpush1.bf16.msra.mxu1 %v2631_v61 }
 0x20d   :  { %2634 = vmatprep.subr.bf16.mxu0 %v2633_v62  ;;  %2666 = vmatprep.subr.bf16.mxu1 %v2633_v62 }
 0x210   :  { %2636 = vmatpush1.bf16.msra.mxu0 %v2635_v4  ;;  %2668 = vmatpush1.bf16.msra.mxu1 %v2635_v4 }
 0x211   :  { %2638 = vmatprep.subr.bf16.mxu0 %v2637_v5  ;;  %2670 = vmatprep.subr.bf16.mxu1 %v2637_v5 }
 0x214   :  { %2640 = vmatpush1.bf16.msra.mxu0 %v2639_v8  ;;  %v524_v9 = vpop.f32.mrb[2].mxu0  ;;  %2672 = vmatpush1.bf16.msra.mxu1 %v2639_v8  ;;  %v596_v10 = vpop.f32.mrb[2].mxu1 }
 0x215   :  { %v525_v11 = vadd.f32 %v3672_v22, %v524_v9  ;;  %v2152_v12 = vpop.f32.mrb[3].mxu0  ;;  %2674 = vmatprep.subr.bf16.mxu0 %v3668_v19  ;;  %v597_v13 = vadd.f32 %v3672_v22, %v596_v10  ;;  %2706 = vmatprep.subr.bf16.mxu1 %v3668_v19  ;;  %v2187_v14 = vpop.f32.mrb[3].mxu1  ;;  %v1344_v9 = vlaneseq }
 0x216   :  { %v1232_v14 = vld [vmem:[#allocation19] sm:$0xff] }
 0x217   :  { %949 = vmatmul.mubr.f32.vlgmr.msra.gmra.mrb[8].mxu0 %v525_v11  ;;  %1019 = vmatmul.mubr.f32.vlgmr.msra.gmra.mrb[8].mxu1 %v597_v13  ;;  %v1345_v11 = vshrl.u32 %v1344_v9, 7  ;;  %v1871_v13 = vld.sshfl [vmem:[#allocation7] sm:$0x11 pattern:$0x75316420]  ;;  %v1242_v9 = vld [vmem:[#allocation19 + $0x50] sm:$0xff] }
 0x218   :  { %2676 = vmatpush1.bf16.msra.mxu0 %v3674_v26  ;;  %2708 = vmatpush1.bf16.msra.mxu1 %v3674_v26  ;;  %v1581_v17 = vcombine.high %v1871_v13, %v1871_v13 }
 0x219   :  { %2678 = vmatprep.subr.bf16.mxu0 %v3677_v30  ;;  %2710 = vmatprep.subr.bf16.mxu1 %v3677_v30  ;;  %v2745_v30 = vpack.c.bf16 %v1205_v29, %v1204_v28 }
 0x21a   :  { %1088 = vmatprep.mubr.f32.mxu0 %v3260_v1  ;;  %1158 = vmatprep.mubr.f32.mxu1 %v3260_v1  ;;  %v1200_v1 = vld [vmem:[#allocation13] sm:$0xff] }
 0x21b   :  { %v2737_v16 = vpack.c.bf16 %v1201_v15, %v1200_v1  ;;  %v3736_v1 = vsub.s32 0, %v1345_v11  ;;  %v3262_v15 = vmov 0  }
 0x21c   :  { %2680 = vmatpush1.bf16.msra.mxu0 %v3681_v37  ;;  %2712 = vmatpush1.bf16.msra.mxu1 %v3681_v37  ;;  %v1211_v37 = vld [vmem:[#allocation13 + $0x58] sm:$0xff] }
 0x21d   :  { %2682 = vmatprep.subr.bf16.mxu0 %v3685_v38  ;;  %2714 = vmatprep.subr.bf16.mxu1 %v3685_v38  ;;  %v2757_v38 = vpack.c.bf16 %v1211_v37, %v1210_v36 }
 0x21e   :  { %2890 = vset.pattern.permute.xlu0 %v3262_v15 }
 0x220   :  { %2684 = vmatpush1.bf16.msra.mxu0 %v3691_v43  ;;  %2716 = vmatpush1.bf16.msra.mxu1 %v3691_v43  ;;  %v1215_v43 = vld [vmem:[#allocation13 + $0x78] sm:$0xff] }
 0x221   :  { %2686 = vmatprep.subr.bf16.mxu0 %v3695_v44  ;;  %2718 = vmatprep.subr.bf16.mxu1 %v3695_v44  ;;  %v2765_v44 = vpack.c.bf16 %v1215_v43, %v1214_v42 }
 0x224   :  { %2688 = vmatpush1.bf16.msra.mxu0 %v3699_v49  ;;  %2720 = vmatpush1.bf16.msra.mxu1 %v3699_v49  ;;  %v1218_v49 = vld [vmem:[#allocation16 + $0x10] sm:$0xff] }
 0x225   :  { %2690 = vmatprep.subr.bf16.mxu0 %v3703_v50  ;;  %2722 = vmatprep.subr.bf16.mxu1 %v3703_v50  ;;  %v1219_v50 = vld [vmem:[#allocation16 + $0x18] sm:$0xff] }
 0x226   :  { %v2773_v52 = vpack.c.bf16 %v1219_v50, %v1218_v49 }
 0x228   :  { %2692 = vmatpush1.bf16.msra.mxu0 %v2627_v55  ;;  %2724 = vmatpush1.bf16.msra.mxu1 %v2627_v55  ;;  %v1222_v55 = vld [vmem:[#allocation16 + $0x30] sm:$0xff] }
 0x229   :  { %2694 = vmatprep.subr.bf16.mxu0 %v2629_v56  ;;  %2726 = vmatprep.subr.bf16.mxu1 %v2629_v56  ;;  %v1223_v56 = vld [vmem:[#allocation16 + $0x38] sm:$0xff] }
 0x22a   :  { %v2781_v57 = vpack.c.bf16 %v1223_v56, %v1222_v55 }
 0x22c   :  { %2696 = vmatpush1.bf16.msra.mxu0 %v2631_v61  ;;  %2728 = vmatpush1.bf16.msra.mxu1 %v2631_v61  ;;  %v1226_v61 = vld [vmem:[#allocation16 + $0x50] sm:$0xff] }
 0x22d   :  { %2698 = vmatprep.subr.bf16.mxu0 %v2633_v62  ;;  %2730 = vmatprep.subr.bf16.mxu1 %v2633_v62  ;;  %v1227_v62 = vld [vmem:[#allocation16 + $0x58] sm:$0xff] }
 0x22e   :  { %v2789_v63 = vpack.c.bf16 %v1227_v62, %v1226_v61 }
 0x230   :  { %2700 = vmatpush1.bf16.msra.mxu0 %v2635_v4  ;;  %2732 = vmatpush1.bf16.msra.mxu1 %v2635_v4  ;;  %v1230_v4 = vld [vmem:[#allocation16 + $0x70] sm:$0xff] }
 0x231   :  { %2702 = vmatprep.subr.bf16.mxu0 %v2637_v5  ;;  %2734 = vmatprep.subr.bf16.mxu1 %v2637_v5  ;;  %v1231_v5 = vld [vmem:[#allocation16 + $0x78] sm:$0xff] }
 0x232   :  { %v2797_v6 = vpack.c.bf16 %v1231_v5, %v1230_v4 }
 0x234   :  { %2704 = vmatpush1.bf16.msra.mxu0 %v2639_v8  ;;  %v668_v19 = vpop.f32.mrb[4].mxu0  ;;  %v740_v20 = vpop.f32.mrb[4].mxu1  ;;  %2736 = vmatpush1.bf16.msra.mxu1 %v2639_v8  ;;  %v1342_v8 = vunpack.c.l.s4 %v3261_v7 }
 0x235   :  { %v669_v21 = vadd.f32 %v3672_v22, %v668_v19  ;;  %v2222_v23 = vpop.f32.mrb[5].mxu0  ;;  %2738 = vmatprep.subr.bf16.mxu0 %v2737_v16  ;;  %v741_v25 = vadd.f32 %v3672_v22, %v740_v20  ;;  %v2257_v26 = vpop.f32.mrb[5].mxu1  ;;  %v2753_v22 = vpack.c.bf16 %v1209_v35, %v1208_v34  ;;  %2770 = vmatprep.subr.bf16.mxu1 %v2769_v48  ;;  %v1234_v19 = vld [vmem:[#allocation19 + $0x10] sm:$0xff]  ;;  %v1235_v20 = vld [vmem:[#allocation19 + $0x18] sm:$0xff]  ;;  %v1241_v34 = vld [vmem:[#allocation19 + $0x48] sm:$0xff] }
 0x236   :  { %v1343_v10 = vunpack.c.0.s8 %v1342_v8  ;;  %v2805_v23 = vpack.c.bf16 %v1235_v20, %v1234_v19  ;;  %v1236_v26 = vld [vmem:[#allocation19 + $0x20] sm:$0xff]  ;;  %v1249_v20 = vld [vmem:[#allocation22 + $0x8] sm:$0xff] }
 0x237   :  { %1089 = vmatmul.mubr.f32.vlgmr.msra.gmra.mrb[10].mxu0 %v669_v21  ;;  %1159 = vmatmul.mubr.f32.vlgmr.msra.gmra.mrb[10].mxu1 %v741_v25  ;;  %v2801_v21 = vpack.c.bf16 %v1233_v18, %v1232_v14  ;;  %v1245_v14 = vld [vmem:[#allocation19 + $0x68] sm:$0xff] }
 0x238   :  { %2740 = vmatpush3.bf16.msra.mxu0 %v2737_v16  ;;  %2290 = vmatprep.mubr.f32.mxu0 %v1198_v27  ;;  %v3734_v12 = vsub.s32 %v1343_v10, %v1345_v11  ;;  %v1237_v27 = vld [vmem:[#allocation19 + $0x28] sm:$0xff]  ;;  %v1243_v10 = vld [vmem:[#allocation19 + $0x58] sm:$0xff] }
 0x239   :  { %2742 = vmatprep.subr.bf16.mxu0 %v2741_v24  ;;  %2772 = vmatpush3.bf16.msra.mxu1 %v2769_v48  ;;  %v2809_v29 = vpack.c.bf16 %v1237_v27, %v1236_v26  ;;  %v2821_v11 = vpack.c.bf16 %v1243_v10, %v1242_v9  ;;  %v1248_v19 = vld [vmem:[#allocation22] sm:$0xff]  ;;  %v1253_v27 = vld [vmem:[#allocation22 + $0x28] sm:$0xff] }
 0x23a   :  { %2774 = vmatprep.subr.bf16.mxu1 %v2773_v52  ;;  %v1588_v16 = vrot.slane %v1871_v13, %v3734_v12  ;;  %v1595_v25 = vrot.slane %v1581_v17, %v3734_v12  ;;  %v1244_v13 = vld [vmem:[#allocation19 + $0x60] sm:$0xff]  ;;  %v1247_v17 = vld [vmem:[#allocation19 + $0x78] sm:$0xff] }
 0x23b   :  { %v2825_v15 = vpack.c.bf16 %v1245_v14, %v1244_v13  ;;  %v1252_v26 = vld [vmem:[#allocation22 + $0x20] sm:$0xff]  ;;  %v1262_v13 = vld [vmem:[#allocation22 + $0x70] sm:$0xff]  ;;  %v1263_v14 = vld [vmem:[#allocation22 + $0x78] sm:$0xff] }
 0x23c   :  { %2744 = vmatpush3.bf16.msra.mxu0 %v2741_v24  ;;  %v1599_v24 = vrot.slane %v1588_v16, %v3736_v1  ;;  %v1603_v28 = vrot.slane %v1595_v25, %v3736_v1  ;;  %v1246_v16 = vld [vmem:[#allocation19 + $0x70] sm:$0xff] }
 0x23d   :  { %2746 = vmatprep.subr.bf16.mxu0 %v2745_v30  ;;  %2776 = vmatpush3.bf16.msra.mxu1 %v2773_v52  ;;  %v2829_v18 = vpack.c.bf16 %v1247_v17, %v1246_v16  ;;  %v1869_v16 = vld [vmem:[#allocation20] ss:$0 sm:$0xff] }
 0x23e   :  { %2778 = vmatprep.subr.bf16.mxu1 %v2777_v54  ;;  %1605 = vperm.xlu0 %2890, %v1599_v24   ;;  %v1251_v24 = vld [vmem:[#allocation22 + $0x18] sm:$0xff] }
 0x240   :  { %2748 = vmatpush3.bf16.msra.mxu0 %v2745_v30  ;;  %v1238_v30 = vld [vmem:[#allocation19 + $0x30] sm:$0xff] }
 0x241   :  { %2750 = vmatprep.subr.bf16.mxu0 %v2749_v33  ;;  %2780 = vmatpush3.bf16.msra.mxu1 %v2777_v54  ;;  %v2813_v32 = vpack.c.bf16 %v1239_v31, %v1238_v30  ;;  %v1255_v30 = vld [vmem:[#allocation22 + $0x38] sm:$0xff] }
 0x242   :  { %2782 = vmatprep.subr.bf16.mxu1 %v2781_v57  ;;  %1609 = vperm.xlu0 %2890, %v1603_v28   ;;  %v2841_v28 = vpack.c.bf16 %v1253_v27, %v1252_v26 }
 0x244   :  { %2752 = vmatpush3.bf16.msra.mxu0 %v2749_v33  ;;  %v1240_v33 = vld [vmem:[#allocation19 + $0x40] sm:$0xff] }
 0x245   :  { %2754 = vmatprep.subr.bf16.mxu0 %v2753_v22  ;;  %2784 = vmatpush3.bf16.msra.mxu1 %v2781_v57  ;;  %v2817_v35 = vpack.c.bf16 %v1241_v34, %v1240_v33  ;;  %v1257_v33 = vld [vmem:[#allocation22 + $0x48] sm:$0xff] }
 0x246   :  { %2786 = vmatprep.subr.bf16.mxu1 %v2785_v60 }
 0x248   :  { %2756 = vmatpush3.bf16.msra.mxu0 %v2753_v22 }
 0x249   :  { %2758 = vmatprep.subr.bf16.mxu0 %v2757_v38  ;;  %2788 = vmatpush3.bf16.msra.mxu1 %v2785_v60 }
 0x24a   :  { %2790 = vmatprep.subr.bf16.mxu1 %v2789_v63 }
 0x24c   :  { %2760 = vmatpush3.bf16.msra.mxu0 %v2757_v38 }
 0x24d   :  { %2762 = vmatprep.subr.bf16.mxu0 %v2761_v41  ;;  %2792 = vmatpush3.bf16.msra.mxu1 %v2789_v63 }
 0x24e   :  { %2794 = vmatprep.subr.bf16.mxu1 %v2793_v3 }
 0x250   :  { %2764 = vmatpush3.bf16.msra.mxu0 %v2761_v41 }
 0x251   :  { %2766 = vmatprep.subr.bf16.mxu0 %v2765_v44  ;;  %2796 = vmatpush3.bf16.msra.mxu1 %v2793_v3 }
 0x252   :  { %2798 = vmatprep.subr.bf16.mxu1 %v2797_v6 }
 0x254   :  { %2768 = vmatpush3.bf16.msra.mxu0 %v2765_v44 }
 0x255   :  { %2800 = vmatpush3.bf16.msra.mxu1 %v2797_v6  ;;  %2802 = vmatprep.subr.bf16.mxu0 %v2801_v21 }
 0x257   :  { %2291 = vmatmul.mubr.f32.vlgmr.msra.gmra.mrb[12].mxu0 %v1199_v45 }
 0x258   :  { %2804 = vmatpush3.bf16.msra.mxu0 %v2801_v21  ;;  %v1250_v21 = vld [vmem:[#allocation22 + $0x10] sm:$0xff] }
 0x259   :  { %2806 = vmatprep.subr.bf16.mxu0 %v2805_v23  ;;  %v2837_v25 = vpack.c.bf16 %v1251_v24, %v1250_v21 }
 0x25c   :  { %2808 = vmatpush3.bf16.msra.mxu0 %v2805_v23  ;;  %v2833_v23 = vpack.c.bf16 %v1249_v20, %v1248_v19 }
 0x25d   :  { %2810 = vmatprep.subr.bf16.mxu0 %v2809_v29 }
 0x25e   :  { %2834 = vmatprep.subr.bf16.mxu1 %v2833_v23 }
 0x260   :  { %2812 = vmatpush3.bf16.msra.mxu0 %v2809_v29  ;;  %v1254_v29 = vld [vmem:[#allocation22 + $0x30] sm:$0xff] }
 0x261   :  { %2814 = vmatprep.subr.bf16.mxu0 %v2813_v32  ;;  %v2845_v31 = vpack.c.bf16 %v1255_v30, %v1254_v29 }
 0x264   :  { %2816 = vmatpush3.bf16.msra.mxu0 %v2813_v32  ;;  %v1256_v32 = vld [vmem:[#allocation22 + $0x40] sm:$0xff] }
 0x265   :  { %2818 = vmatprep.subr.bf16.mxu0 %v2817_v35  ;;  %v2849_v34 = vpack.c.bf16 %v1257_v33, %v1256_v32 }
 0x268   :  { %2820 = vmatpush3.bf16.msra.mxu0 %v2817_v35  ;;  %v1258_v35 = vld [vmem:[#allocation22 + $0x50] sm:$0xff] }
 0x269   :  { %2822 = vmatprep.subr.bf16.mxu0 %v2821_v11 }
 0x26c   :  { %2824 = vmatpush3.bf16.msra.mxu0 %v2821_v11 }
 0x26d   :  { %2826 = vmatprep.subr.bf16.mxu0 %v2825_v15 }
 0x270   :  { %2828 = vmatpush3.bf16.msra.mxu0 %v2825_v15  ;;  %v2861_v15 = vpack.c.bf16 %v1263_v14, %v1262_v13 }
 0x271   :  { %2830 = vmatprep.subr.bf16.mxu0 %v2829_v18 }
 0x274   :  { %2832 = vmatpush3.bf16.msra.mxu0 %v2829_v18 }
 0x2ca   :  { %v810_v22 = vpop.f32.mrb[6].mxu0  ;;  %v3742_v36 = vpop.f32.mrb[6].mxu1 }
 0x2cb   :  { %v3744_v37 = vpop.f32.mrb[7].mxu0  ;;  %v882_v38 = vpop.f32.mrb[7].mxu1  ;;  %v1259_v22 = vld [vmem:[#allocation22 + $0x58] sm:$0xff]  ;;  %v1190_v17 = vadd.f32 %v1869_v16, %v3742_v36  ;;  %v1870_v36 = vld [vmem:[#allocation23] ss:$0 sm:$0xff] }
 0x2cc   :  { %v2853_v38 = vpack.c.bf16 %v1259_v22, %v1258_v35 }
 0x2cd   :  { %v1698_v18 = vrot.slane %v1190_v17, %v3734_v12 }
 0x2cf   :  { %v1699_v19 = vcombine.high %v1698_v18, %v1698_v18  ;;  %v1706_v21 = vrot.slane %v1698_v18, %v3734_v12 }
 0x2d1   :  { %v1713_v20 = vrot.slane %v1699_v19, %v3734_v12 }
 0x2ea   :  { %v950_v39 = vpop.f32.mrb[8].mxu0  ;;  %v1020_v40 = vpop.f32.mrb[8].mxu1 }
 0x2eb   :  { %v3746_v41 = vpop.f32.mrb[9].mxu0  ;;  %v1022_v42 = vpop.f32.mrb[9].mxu1  ;;  %v1174_v49 = vadd.f32 %v1867_v47, %v1020_v40  ;;  %v1260_v39 = vld [vmem:[#allocation22 + $0x60] sm:$0xff]  ;;  %v1261_v40 = vld [vmem:[#allocation22 + $0x68] sm:$0xff] }
 0x2ec   :  { %v2857_v42 = vpack.c.bf16 %v1261_v40, %v1260_v39 }
 0x2ed   :  { %v1347_v51 = vrot.slane %v1174_v49, %v3734_v12 }
 0x2ef   :  { %v1348_v53 = vcombine.high %v1347_v51, %v1347_v51  ;;  %v1355_v57 = vrot.slane %v1347_v51, %v3734_v12 }
 0x2f1   :  { %v1362_v56 = vrot.slane %v1348_v53, %v3734_v12  ;;  %v1366_v62 = vrot.slane %v1355_v57, %v3736_v1 }
 0x2f3   :  { %v1370_v60 = vrot.slane %v1362_v56, %v3736_v1 }
 0x30a   :  { %v1090_v43 = vpop.f32.mrb[10].mxu0  ;;  %v1160_v44 = vpop.f32.mrb[10].mxu1 }
 0x30b   :  { %v3748_v45 = vpop.f32.mrb[11].mxu0  ;;  %v1162_v46 = vpop.f32.mrb[11].mxu1  ;;  %v1175_v48 = vadd.f32 %v1867_v47, %v1160_v44  ;;  %v1868_v43 = vld [vmem:[#allocation17] ss:$0 sm:$0xff] }
 0x30c   :  { %v1182_v44 = vadd.f32 %v1868_v43, %v3746_v41  ;;  %v1183_v47 = vadd.f32 %v1868_v43, %v3748_v45 }
 0x30d   :  { %v1384_v50 = vrot.slane %v1175_v48, %v3734_v12 }
 0x30e   :  { %v1506_v46 = vrot.slane %v1182_v44, %v3734_v12  ;;  %v1543_v49 = vrot.slane %v1183_v47, %v3734_v12 }
 0x30f   :  { %v1385_v52 = vcombine.high %v1384_v50, %v1384_v50  ;;  %v1392_v55 = vrot.slane %v1384_v50, %v3734_v12 }
 0x310   :  { %v1507_v48 = vcombine.high %v1506_v46, %v1506_v46  ;;  %v1544_v50 = vcombine.high %v1543_v49, %v1543_v49  ;;  %v1551_v41 = vrot.slane %v1543_v49, %v3734_v12 }
 0x311   :  { %v1399_v54 = vrot.slane %v1385_v52, %v3734_v12  ;;  %v1403_v59 = vrot.slane %v1392_v55, %v3736_v1  ;;  %v1514_v52 = vrot.slane %v1506_v46, %v3734_v12 }
 0x312   :  { %v1521_v51 = vrot.slane %v1507_v48, %v3734_v12 }
 0x313   :  { %v1407_v58 = vrot.slane %v1399_v54, %v3736_v1  ;;  %v1558_v54 = vrot.slane %v1544_v50, %v3734_v12  ;;  %v1525_v56 = vrot.slane %v1514_v52, %v3736_v1 }
 0x314   :  { %v1529_v53 = vrot.slane %v1521_v51, %v3736_v1 }
 0x32a   :  { %v2292_v61 = vpop.f32.mrb[12].mxu0 }
 0x32b   :  { %v1374_v63 = vadd.f32 %v2292_v61, %v1370_v60  ;;  %v1411_v0 = vadd.f32 %v2292_v61, %v1407_v58  ;;  %v1331_v2 = vpop.f32.mrb[13].mxu0  ;;  %v1566_v60 = vrot.slane %v1558_v54, %v3736_v1 }
 0x32c   :  { %v1373_v3 = vadd.f32 %v1366_v62, %v1331_v2  ;;  %v1410_v4 = vadd.f32 %v1403_v59, %v1331_v2  ;;  %v1606_v59 = vpop.permute.xlu0 %1605  ;;  %v1562_v62 = vrot.slane %v1551_v41, %v3736_v1 }
 0x32d   :  { %v1376_v6 = vmax.f32 %v1374_v63, 0.0  ;;  %v1413_v8 = vmax.f32 %v1411_v0, 0.0 }
 0x32e   :  { %v1375_v5 = vmax.f32 %v1373_v3, 0.0  ;;  %v1412_v7 = vmax.f32 %v1410_v4, 0.0 }
 0x330   :  { %2325 = vmatprep.mubr.f32.mxu1 %v1375_v5  ;;  %v1610_v5 = vpop.permute.xlu0 %1609 }
 0x331   :  { %2326 = vmatmul.mubr.f32.vlgmr.msra.gmra.mrb[12].mxu1 %v1376_v6 }
 0x332   :  { %2328 = vmatprep.mubr.f32.mxu1 %v1412_v7  ;;  %2836 = vmatpush3.bf16.msra.mxu1 %v2833_v23  ;;  %v1721_v23 = vrot.slane %v1713_v20, %v3736_v1 }
 0x333   :  { %2838 = vmatprep.subr.bf16.mxu1 %v2837_v25 }
 0x335   :  { %2329 = vmatmul.mubr.f32.gmra.mrb[14].mxu1 %v1413_v8 }
 0x336   :  { %2840 = vmatpush3.bf16.msra.mxu1 %v2837_v25  ;;  %v1717_v25 = vrot.slane %v1706_v21, %v3736_v1 }
 0x337   :  { %2842 = vmatprep.subr.bf16.mxu1 %v2841_v28 }
 0x33a   :  { %2844 = vmatpush3.bf16.msra.mxu1 %v2841_v28 }
 0x33b   :  { %2846 = vmatprep.subr.bf16.mxu1 %v2845_v31 }
 0x33e   :  { %2848 = vmatpush3.bf16.msra.mxu1 %v2845_v31  ;;  %v1197_v31 = vadd.f32 %v1870_v36, %v3744_v37 }
 0x33f   :  { %2850 = vmatprep.subr.bf16.mxu1 %v2849_v34 }
 0x340   :  { %v1810_v32 = vrot.slane %v1197_v31, %v3734_v12 }
 0x342   :  { %2852 = vmatpush3.bf16.msra.mxu1 %v2849_v34  ;;  %v1811_v33 = vcombine.high %v1810_v32, %v1810_v32  ;;  %v1818_v35 = vrot.slane %v1810_v32, %v3734_v12 }
 0x343   :  { %2854 = vmatprep.subr.bf16.mxu1 %v2853_v38 }
 0x344   :  { %v1825_v34 = vrot.slane %v1811_v33, %v3734_v12  ;;  %v1829_v39 = vrot.slane %v1818_v35, %v3736_v1 }
 0x346   :  { %2856 = vmatpush3.bf16.msra.mxu1 %v2853_v38  ;;  %v1833_v22 = vrot.slane %v1825_v34, %v3736_v1 }
 0x347   :  { %2858 = vmatprep.subr.bf16.mxu1 %v2857_v42 }
 0x34a   :  { %2860 = vmatpush3.bf16.msra.mxu1 %v2857_v42 }
 0x34b   :  { %2862 = vmatprep.subr.bf16.mxu1 %v2861_v15 }
 0x34e   :  { %2864 = vmatpush3.bf16.msra.mxu1 %v2861_v15 }
 0x404   :  { %v2327_v55 = vpop.f32.mrb[12].mxu1 }
 0x405   :  { %v1533_v57 = vadd.f32 %v2327_v55, %v1529_v53  ;;  %v1480_v58 = vpop.f32.mrb[13].mxu1 }
 0x406   :  { %v1532_v45 = vadd.f32 %v1525_v56, %v1480_v58 }
 0x407   :  { %v1535_v6 = vmax.f32 %v1533_v57, 0.0 }
 0x408   :  { %v2330_v61 = vpop.f32.mrb[14].mxu1  ;;  %v1534_v8 = vmax.f32 %v1532_v45, 0.0 }
 0x409   :  { %v1570_v63 = vadd.f32 %v2330_v61, %v1566_v60  ;;  %v1490_v0 = vpop.f32.mrb[15].mxu1 }
 0x40a   :  { %v1569_v2 = vadd.f32 %v1562_v62, %v1490_v0 }
 0x40b   :  { %v1572_v3 = vmax.f32 %v1570_v63, 0.0 }
 0x40c   :  { %v1571_v4 = vmax.f32 %v1569_v2, 0.0 }
 0x40d   :  { %v1613_v7 = vmul.f32 %v1610_v5, %v1572_v3 }
 0x40e   :  { %v1612_v9 = vmul.f32 %v1606_v59, %v1571_v4 }
 0x40f   :  { %v1615_v10 = vadd.f32 %v1613_v7, %v1535_v6 }
 0x410   :  { %v1614_v11 = vadd.f32 %v1612_v9, %v1534_v8 }
 0x412   :  { %2363 = vmatprep.mubr.f32.mxu0 %v1614_v11 }
 0x413   :  { %2364 = vmatmul.mubr.f32.vlgmr.msra.gmra.mrb[14].mxu0 %v1615_v10 }
 0x4e6   :  { %v2365_v24 = vpop.f32.mrb[14].mxu0 }
 0x4e7   :  { %v1725_v26 = vadd.f32 %v2365_v24, %v1721_v23  ;;  %v1682_v27 = vpop.f32.mrb[15].mxu0 }
 0x4e8   :  { %v1724_v28 = vadd.f32 %v1717_v25, %v1682_v27 }
 0x4e9   :  { %v1727_v30 = vmax.f32 %v1725_v26, 0.0 }
 0x4ea   :  { %v1726_v29 = vmax.f32 %v1724_v28, 0.0 }
 0x4ec   :  { %2398 = vmatprep.mubr.f32.mxu1 %v1726_v29 }
 0x4ed   :  { %2399 = vmatmul.mubr.f32.vlgmr.msra.gmra.mrb[16].mxu1 %v1727_v30 }
 0x5c0   :  { %v2400_v38 = vpop.f32.mrb[16].mxu1 }
 0x5c1   :  { %v1837_v40 = vadd.f32 %v2400_v38, %v1833_v22  ;;  %v1794_v42 = vpop.f32.mrb[17].mxu1 }
 0x5c2   :  { %v1836_v43 = vadd.f32 %v1829_v39, %v1794_v42 }
 0x5c3   :  { %v1839_v44 = vmax.f32 %v1837_v40, 0.0 }
 0x5c4   :  { %v1838_v46 = vmax.f32 %v1836_v43, 0.0 }
 0x5c5   :  { %1841 = vst [vmem:[#allocation25 + $0x8] sm:$0xff] %v1839_v44 }
 0x5c6   :  { %1840 = vst [vmem:[#allocation25] sm:$0xff] %v1838_v46 }
 0x5c7   :  { %3210 = shalt.err (!%p3207_p4)
}
 0x5c8   :  { %s3211_s20 = scalar_lea.hbm %s3813_s14, 256 }
 0x5c9   :  { %p3212_p5 = scmp.ne.s32.totalorder %s3813_s14, %s3211_s20  ;;  %p3215_p6 = scmp.lt.u32.totalorder %s3211_s20, %s3813_s14 }
 0x5cb   :  { %p3217_p7 = pnand %p3215_p6, %p3212_p5 }
 0x5cd   :  { %3220 = shalt.err (!%p3217_p7)
}
 0x5ce   :  { %1853 = dma.vmem_to_hbm [thread:$0]  %s1848_s4, 256, %s3813_s14, [#allocation4], %s3240_s23, %s3240_s23, %s3241_s24  }
 0x5cf   :  { %3237 = dma.done.wait [#allocation4], 256  }
 0x5d0   :  { %3238 = vsyncadd [#allocation4], 4294967040 }
 0x5d1   :  { %1857 = vsyncpa [#allocation3], 1 }
 0x5d2   :  { %1858 = vsyncpa [#allocation6], 1 }
 0x5d3   :  { %1859 = vsyncpa [#allocation9], 1 }
 0x5d4   :  { %1860 = vsyncpa [#allocation12], 1 }
 0x5d5   :  { %1861 = vsyncpa [#allocation15], 1 }
 0x5d6   :  { %1862 = vsyncpa [#allocation18], 1 }
 0x5d7   :  { %1863 = vsyncpa [#allocation21], 1 }
 0x5d8   :  { %1864 = vsyncpa [#allocation24], 1 }
 0x5d9   :  { %1865 = vsyncpa [#allocation4], 1 }

</bundles_post_ra>
